<compile_context>
chip_gen: v7x
topology: tpu7x:2x2x1
jax: 0.10.0
libtpu: 0.0.40
codegen_flags: <defaults>
</compile_context>

<pallas_src>
import functools

import jax
import jax.numpy as jnp
from jax.experimental import pallas as pl
from jax.experimental.pallas import tpu as pltpu


# ---------------------------------------------------------------------------
# Helpers
# ---------------------------------------------------------------------------
def _pick_tile(n, candidates, min_steps=1):
    """Largest candidate tile dividing n with at least min_steps grid steps."""
    for c in candidates:
        if n % c == 0 and n // c >= min_steps:
            return c
    return n  # TODO(synk): non-divisible large extents fall back to one slab.


@functools.lru_cache(maxsize=None)
def _vmem_limit_bytes():
    """Generation-aware scoped-VMEM budget (headroom under physical VMEM)."""
    cap = 64 * 1024 * 1024  # conservative fallback (v7x physical per-TC)
    try:
        info = pltpu.get_tpu_info()
        cap = int(getattr(info, "vmem_capacity_bytes", cap))
    except Exception:
        pass
    return max(int(cap * 3 // 4), 16 * 1024 * 1024)


def _lerp_and_step(step, momentum):
    """step+1 and the debiased EMA lerp weight (1-beta)/(1-beta**step)."""
    new_step = step + 1
    beta = jnp.float32(momentum)
    lerp_w = (1.0 - beta) / (1.0 - jnp.power(beta,
                                             new_step.astype(jnp.float32)))
    return jnp.reshape(lerp_w, (1,)).astype(jnp.float32), new_step


# ---------------------------------------------------------------------------
# DatasetNorm kernels
# ---------------------------------------------------------------------------
def _dn_single_kernel(lerp_ref, x_ref, w_ref, stats_ref, out_ref,
                      new_stats_ref):
    """Single-pass: one (N, tf) feature tile - stats, EMA update, normalize."""
    x = x_ref[...].astype(jnp.float32)                       # [N, tf]
    mean = jnp.mean(x, axis=0, keepdims=True)                # [1, tf]
    sq_mean = jnp.mean(x * x, axis=0, keepdims=True)         # [1, tf]

    lerp_w = lerp_ref[0]                                     # SMEM scalar
    old_m = stats_ref[0:1, :]
    old_s = stats_ref[1:2, :]
    new_m = old_m + lerp_w * (mean - old_m)                  # stats.lerp_
    new_s = old_s + lerp_w * (sq_mean - old_s)
    new_stats_ref[0:1, :] = new_m
    new_stats_ref[1:2, :] = new_s

    # (x - m)/std*w + b == x*a + c ; a = w*rsqrt(var), c = b - m*a
    inv_std = jax.lax.rsqrt(jnp.maximum(new_s - new_m * new_m, 1e-6))
    a = w_ref[0:1, :] * inv_std
    c = w_ref[1:2, :] - new_m * a
    out_ref[...] = (x * a + c).astype(out_ref.dtype)


def _dn_stats_kernel(lerp_ref, x_ref, stats_ref, new_stats_ref, acc_ref, *,
                     inv_n):
    """Pass 1 (batch-tiled): accumulate sum / sum-sq, EMA-update on last step."""
    b = pl.program_id(1)

    @pl.when(b == 0)
    def _():
        acc_ref[...] = jnp.zeros_like(acc_ref)

    x = x_ref[...].astype(jnp.float32)                       # [tn, tf]
    acc_ref[0:1, :] += jnp.sum(x, axis=0, keepdims=True)
    acc_ref[1:2, :] += jnp.sum(x * x, axis=0, keepdims=True)

    @pl.when(b == pl.num_programs(1) - 1)
    def _():
        lerp_w = lerp_ref[0]
        mean = acc_ref[0:1, :] * inv_n
        sq_mean = acc_ref[1:2, :] * inv_n
        new_stats_ref[0:1, :] = (stats_ref[0:1, :]
                                 + lerp_w * (mean - stats_ref[0:1, :]))
        new_stats_ref[1:2, :] = (stats_ref[1:2, :]
                                 + lerp_w * (sq_mean - stats_ref[1:2, :]))


def _dn_apply_kernel(x_ref, w_ref, stats_ref, out_ref):
    """Pass 2 (batch-tiled): normalize with the updated stats."""
    new_m = stats_ref[0:1, :]
    new_s = stats_ref[1:2, :]
    inv_std = jax.lax.rsqrt(jnp.maximum(new_s - new_m * new_m, 1e-6))
    a = w_ref[0:1, :] * inv_std
    c = w_ref[1:2, :] - new_m * a
    out_ref[...] = (x_ref[...].astype(jnp.float32) * a + c).astype(
        out_ref.dtype)


def _dataset_norm_core(x, w2f, stats2f, lerp_arr, *, force_tiled=False):
    """Returns (normalized x, new_stats [2,F])."""
    N, F = x.shape
    vmem_limit = _vmem_limit_bytes()
    budget = int(vmem_limit * 0.6)
    tf = _pick_tile(F, (1024, 512, 256, 128))
    single_bytes = 5 * N * tf * 4          # x + out double-buffered + slack

    if not force_tiled and single_bytes <= budget:
        grid = (F // tf,)
        out, new_stats2f = pl.pallas_call(
            _dn_single_kernel,
            out_shape=(jax.ShapeDtypeStruct((N, F), x.dtype),
                       jax.ShapeDtypeStruct((2, F), jnp.float32)),
            grid=grid,
            in_specs=[
                pl.BlockSpec(memory_space=pltpu.MemorySpace.SMEM),  # lerp
                pl.BlockSpec((N, tf), lambda j: (0, j)),            # x
                pl.BlockSpec((2, tf), lambda j: (0, j)),            # scale/bias
                pl.BlockSpec((2, tf), lambda j: (0, j)),            # stats
            ],
            out_specs=(
                pl.BlockSpec((N, tf), lambda j: (0, j)),
                pl.BlockSpec((2, tf), lambda j: (0, j)),
            ),
            input_output_aliases={3: 1},                            # stats
            compiler_params=pltpu.CompilerParams(
                dimension_semantics=("parallel",),
                vmem_limit_bytes=vmem_limit),
        )(lerp_arr, x, w2f, stats2f)
        return out, new_stats2f

    # ---- large-N fallback: batch-tiled stats pass + normalize pass --------
    tn = N
    for c in (1024, 512, 256, 128):
        if N % c == 0 and 5 * c * tf * 4 <= budget:
            tn = c
            break
    grid = (F // tf, N // tn)       # batch = trailing reduction axis (pass 1)

    new_stats2f = pl.pallas_call(
        functools.partial(_dn_stats_kernel, inv_n=1.0 / N),
        out_shape=jax.ShapeDtypeStruct((2, F), jnp.float32),
        grid=grid,
        in_specs=[
            pl.BlockSpec(memory_space=pltpu.MemorySpace.SMEM),
            pl.BlockSpec((tn, tf), lambda j, i: (i, j)),
            pl.BlockSpec((2, tf), lambda j, i: (0, j)),
        ],
        out_specs=pl.BlockSpec((2, tf), lambda j, i: (0, j)),
        scratch_shapes=[pltpu.VMEM((2, tf), jnp.float32)],
        input_output_aliases={2: 0},
        compiler_params=pltpu.CompilerParams(
            dimension_semantics=("parallel", "arbitrary"),
            vmem_limit_bytes=vmem_limit),
    )(lerp_arr, x, stats2f)

    out = pl.pallas_call(
        _dn_apply_kernel,
        out_shape=jax.ShapeDtypeStruct((N, F), x.dtype),
        grid=grid,
        in_specs=[
            pl.BlockSpec((tn, tf), lambda j, i: (i, j)),
            pl.BlockSpec((2, tf), lambda j, i: (0, j)),
            pl.BlockSpec((2, tf), lambda j, i: (0, j)),
        ],
        out_specs=pl.BlockSpec((tn, tf), lambda j, i: (i, j)),
        compiler_params=pltpu.CompilerParams(
            dimension_semantics=("parallel", "parallel"),
            vmem_limit_bytes=vmem_limit),
    )(x, w2f, new_stats2f)
    return out, new_stats2f


def dataset_norm(x, weight, stats, step, *, momentum=0.99, force_tiled=False):
    """Functional DatasetNorm forward.

    x: [N, F]; weight: [F, 2] (col 0 scale, col 1 bias); stats: [2F];
    step: scalar int32 (pre-increment).  Returns (out, new_stats, new_step).
    """
    assert 0.0 <= momentum < 1.0
    N, F = x.shape
    lerp_arr, new_step = _lerp_and_step(step, momentum)
    w2f = jnp.transpose(weight).astype(jnp.float32)            # [2, F]
    stats2f = jnp.reshape(stats.astype(jnp.float32), (2, F))   # [2, F]
    out, new_stats2f = _dataset_norm_core(x, w2f, stats2f, lerp_arr,
                                          force_tiled=force_tiled)
    return out, jnp.reshape(new_stats2f, (2 * F,)), new_step


# ---------------------------------------------------------------------------
# Fused residual block: Linear -> Sine -> DatasetNorm -> Linear -> +residual
# ---------------------------------------------------------------------------
def _block_kernel(lerp_ref, h_ref, w1_ref, b1_ref, nw_ref, stats_ref,
                  w2_ref, b2_ref, o_ref, new_stats_ref, acc_ref, *, mm_dtype):
    k = pl.program_id(0)
    h32 = h_ref[...].astype(jnp.float32)                       # [N, width]

    @pl.when(k == 0)
    def _init():
        acc_ref[...] = h32 + b2_ref[...]        # residual + lin2 bias

    # lin1 on this expanded-feature tile + sine
    t = jnp.dot(h_ref[...].astype(mm_dtype), w1_ref[...].astype(mm_dtype),
                preferred_element_type=jnp.float32)             # [N, te]
    t = jnp.sin(t + b1_ref[...])

    # DatasetNorm for this tile (stats are per-feature, so tiling is exact)
    mean = jnp.mean(t, axis=0, keepdims=True)
    sq_mean = jnp.mean(t * t, axis=0, keepdims=True)
    lerp_w = lerp_ref[0]
    old_m = stats_ref[0:1, :]
    old_s = stats_ref[1:2, :]
    new_m = old_m + lerp_w * (mean - old_m)
    new_s = old_s + lerp_w * (sq_mean - old_s)
    new_stats_ref[0:1, :] = new_m
    new_stats_ref[1:2, :] = new_s
    inv_std = jax.lax.rsqrt(jnp.maximum(new_s - new_m * new_m, 1e-6))
    a = nw_ref[0:1, :] * inv_std
    c = nw_ref[1:2, :] - new_m * a
    tn = t * a + c                                              # [N, te]

    # lin2 partial contribution: K-reduction over the expanded axis
    acc_ref[...] += jnp.dot(tn.astype(mm_dtype), w2_ref[...].astype(mm_dtype),
                            preferred_element_type=jnp.float32)

    @pl.when(k == pl.num_programs(0) - 1)
    def _finalize():
        o_ref[...] = acc_ref[...].astype(o_ref.dtype)


def _fused_block_fits(n, width, expanded, te):
    need = 4 * (5 * n * width + 3 * n * te + 6 * width * te + 16 * te)
    return need <= int(_vmem_limit_bytes() * 0.7)


def _fused_block(h, blk, lerp_arr, *, te, mm_dtype):
    N, width = h.shape
    w1, b1 = blk["lin1"]["w"], blk["lin1"]["b"]
    w2, b2 = blk["lin2"]["w"], blk["lin2"]["b"]
    expanded = w1.shape[1]
    grid = (expanded // te,)

    nw2f = jnp.transpose(blk["norm"]["weight"]).astype(jnp.float32)
    stats2f = jnp.reshape(blk["norm"]["stats"].astype(jnp.float32),
                          (2, expanded))
    b1_2d = jnp.reshape(b1.astype(jnp.float32), (1, expanded))
    b2_2d = jnp.reshape(b2.astype(jnp.float32), (1, width))
    vmem_limit = _vmem_limit_bytes()

    out, new_stats2f = pl.pallas_call(
        functools.partial(_block_kernel, mm_dtype=mm_dtype),
        out_shape=(jax.ShapeDtypeStruct((N, width), h.dtype),
                   jax.ShapeDtypeStruct((2, expanded), jnp.float32)),
        grid=grid,
        in_specs=[
            pl.BlockSpec(memory_space=pltpu.MemorySpace.SMEM),   # lerp
            pl.BlockSpec((N, width), lambda k: (0, 0)),          # h (resident)
            pl.BlockSpec((width, te), lambda k: (0, k)),         # w1 tile
            pl.BlockSpec((1, te), lambda k: (0, k)),             # b1 tile
            pl.BlockSpec((2, te), lambda k: (0, k)),             # norm w
            pl.BlockSpec((2, te), lambda k: (0, k)),             # stats
            pl.BlockSpec((te, width), lambda k: (k, 0)),         # w2 tile
            pl.BlockSpec((1, width), lambda k: (0, 0)),          # b2
        ],
        out_specs=(
            pl.BlockSpec((N, width), lambda k: (0, 0)),          # accumulator
            pl.BlockSpec((2, te), lambda k: (0, k)),
        ),
        scratch_shapes=[pltpu.VMEM((N, width), jnp.float32)],
        input_output_aliases={5: 1},                             # stats
        compiler_params=pltpu.CompilerParams(
            dimension_semantics=("arbitrary",),
            vmem_limit_bytes=vmem_limit),
    )(lerp_arr, h, w1.astype(jnp.float32), b1_2d, nw2f, stats2f,
      w2.astype(jnp.float32), b2_2d)

    return out, jnp.reshape(new_stats2f, (2 * expanded,))


# ---------------------------------------------------------------------------
# Standalone fused Linear (+Sine)(+Residual) with K-reduction tiling
# ---------------------------------------------------------------------------
def _linear_kernel(x_ref, w_ref, b_ref, o_ref, acc_ref, *, apply_sine,
                   mm_dtype):
    k = pl.program_id(1)

    @pl.when(k == 0)
    def _():
        acc_ref[...] = jnp.zeros_like(acc_ref)

    acc_ref[...] += jnp.dot(x_ref[...].astype(mm_dtype),
                            w_ref[...].astype(mm_dtype),
                            preferred_element_type=jnp.float32)

    @pl.when(k == pl.num_programs(1) - 1)
    def _():
        r = acc_ref[...] + b_ref[...]
        if apply_sine:
            r = jnp.sin(r)
        o_ref[...] = r.astype(o_ref.dtype)


def _linear_residual_kernel(x_ref, w_ref, b_ref, r_ref, o_ref, acc_ref, *,
                            mm_dtype):
    k = pl.program_id(1)

    @pl.when(k == 0)
    def _():
        acc_ref[...] = jnp.zeros_like(acc_ref)

    acc_ref[...] += jnp.dot(x_ref[...].astype(mm_dtype),
                            w_ref[...].astype(mm_dtype),
                            preferred_element_type=jnp.float32)

    @pl.when(k == pl.num_programs(1) - 1)
    def _():
        o_ref[...] = (acc_ref[...] + b_ref[...]
                      + r_ref[...].astype(jnp.float32)).astype(o_ref.dtype)


def linear(x, w, b, *, apply_sine=False, residual=None,
           mm_dtype=jnp.float32):
    """y = x @ w + b [+ sin] [+ residual].  Tiny contractions / lane-narrow
    outputs (e.g. in_shape=2, out_shape=1) are routed to plain XLA — the MXU
    is ~idle there and a <128-lane output forces masked partial stores."""
    M, K = x.shape
    _, N = w.shape
    if K < 128 or N < 128 or M < 8:
        acc = jnp.dot(x.astype(jnp.float32), w.astype(jnp.float32),
                      preferred_element_type=jnp.float32)
        acc = acc + b.astype(jnp.float32)
        if apply_sine:
            acc = jnp.sin(acc)
        if residual is not None:
            acc = acc + residual.astype(jnp.float32)
        return acc.astype(x.dtype)

    tm = _pick_tile(M, (512, 256, 128))
    tk = _pick_tile(K, (512, 256, 128))
    grid = (M // tm, K // tk)
    b2 = jnp.reshape(b.astype(jnp.float32), (1, N))
    vmem_limit = _vmem_limit_bytes()

    x_spec = pl.BlockSpec((tm, tk), lambda i, k: (i, k))
    w_spec = pl.BlockSpec((tk, N), lambda i, k: (k, 0))
    b_spec = pl.BlockSpec((1, N), lambda i, k: (0, 0))
    o_spec = pl.BlockSpec((tm, N), lambda i, k: (i, 0))
    cp = pltpu.CompilerParams(dimension_semantics=("parallel", "arbitrary"),
                              vmem_limit_bytes=vmem_limit)
    out_shape = jax.ShapeDtypeStruct((M, N), x.dtype)
    scratch = [pltpu.VMEM((tm, N), jnp.float32)]

    if residual is None:
        kernel = functools.partial(_linear_kernel, apply_sine=apply_sine,
                                   mm_dtype=mm_dtype)
        return pl.pallas_call(
            kernel, out_shape=out_shape, grid=grid,
            in_specs=[x_spec, w_spec, b_spec], out_specs=o_spec,
            scratch_shapes=scratch, compiler_params=cp,
        )(x, w, b2)

    assert not apply_sine  # module only applies sine on the expand linear
    r_spec = pl.BlockSpec((tm, N), lambda i, k: (i, 0))
    kernel = functools.partial(_linear_residual_kernel, mm_dtype=mm_dtype)
    return pl.pallas_call(
        kernel, out_shape=out_shape, grid=grid,
        in_specs=[x_spec, w_spec, b_spec, r_spec], out_specs=o_spec,
        scratch_shapes=scratch, compiler_params=cp,
    )(x, w, b2, residual)


# ---------------------------------------------------------------------------
# MLP: init + Pallas forward + pure-JAX reference
# ---------------------------------------------------------------------------
def _init_linear(key, fan_in, fan_out):
    kw, kb = jax.random.split(key)
    bound = float(fan_in) ** -0.5
    return {
        "w": jax.random.uniform(kw, (fan_in, fan_out), jnp.float32,
                                -bound, bound),
        "b": jax.random.uniform(kb, (fan_out,), jnp.float32, -bound, bound),
    }


def _init_norm(features):
    return {
        "weight": jnp.stack([jnp.ones((features,), jnp.float32),
                             jnp.zeros((features,), jnp.float32)], axis=1),
        "stats": jnp.zeros((2 * features,), jnp.float32),
        "step": jnp.asarray(0, jnp.int32),
    }


def init_mlp(key, in_shape, out_shape, width, depth, expanded):
    keys = jax.random.split(key, 2 * (depth - 1) + 2)
    params = {
        "lin_in": _init_linear(keys[0], in_shape, width),
        "blocks": [],
        "norm_out": _init_norm(width),
        "lin_out": _init_linear(keys[1], width, out_shape),
    }
    for d in range(depth - 1):
        params["blocks"].append({
            "lin1": _init_linear(keys[2 + 2 * d], width, expanded),
            "norm": _init_norm(expanded),
            "lin2": _init_linear(keys[3 + 2 * d], expanded, width),
        })
    return params


def mlp_forward(params, x, *, momentum=0.99, matmul_dtype=None,
                fuse_blocks=True):
    """Pallas forward of MLP:
       Linear -> [Residual(Linear+Sine+DatasetNorm+Linear)]*(depth-1)
              -> DatasetNorm -> Linear.
       Returns (out, [(new_stats, new_step), ...]) for every DatasetNorm."""
    mm_dtype = jnp.float32 if matmul_dtype is None else matmul_dtype

    # Input projection (K is tiny): linear() routes it to plain XLA.
    h = linear(x, params["lin_in"]["w"], params["lin_in"]["b"],
               mm_dtype=mm_dtype)
    N, width = h.shape
    norm_states = []

    for blk in params["blocks"]:
        expanded = blk["lin1"]["w"].shape[1]
        te = _pick_tile(expanded, (512, 256, 128), min_steps=2)
        if fuse_blocks and _fused_block_fits(N, width, expanded, te):
            lerp_arr, new_step = _lerp_and_step(blk["norm"]["step"], momentum)
            h, new_stats = _fused_block(h, blk, lerp_arr, te=te,
                                        mm_dtype=mm_dtype)
            norm_states.append((new_stats, new_step))
        else:  # large-N fallback: separate batch-tiled kernels
            t = linear(h, blk["lin1"]["w"], blk["lin1"]["b"], apply_sine=True,
                       mm_dtype=mm_dtype)
            t, ns, st = dataset_norm(t, blk["norm"]["weight"],
                                     blk["norm"]["stats"],
                                     blk["norm"]["step"], momentum=momentum)
            norm_states.append((ns, st))
            h = linear(t, blk["lin2"]["w"], blk["lin2"]["b"], residual=h,
                       mm_dtype=mm_dtype)

    h, ns, st = dataset_norm(h, params["norm_out"]["weight"],
                             params["norm_out"]["stats"],
                             params["norm_out"]["step"], momentum=momentum)
    norm_states.append((ns, st))

    # Output projection (out_shape may be lane-narrow): plain XLA via linear().
    out = linear(h, params["lin_out"]["w"], params["lin_out"]["b"],
                 mm_dtype=mm_dtype)
    return out, norm_states


# ---------------------------------------------------------------------------
# Pure-JAX references
# ---------------------------------------------------------------------------
def _ref_dataset_norm(x, weight, stats, step, momentum):
    F = x.shape[1]
    mean = x.mean(axis=0)
    sq = (x * x).mean(axis=0)
    bstats = jnp.concatenate([mean, sq])
    step = step + 1
    beta = jnp.float32(momentum)
    beta_db = 1.0 - (1.0 - beta) / (1.0 - jnp.power(beta,
                                                    step.astype(jnp.float32)))
    stats = stats + (1.0 - beta_db) * (bstats - stats)
    m, s = stats[:F], stats[F:]
    std = jnp.sqrt(jnp.maximum(s - m * m, 1e-6))
    return (x - m) / std * weight[:, 0] + weight[:, 1], stats, step


def _ref_mlp_forward(params, x, momentum):
    h = x @ params["lin_in"]["w"] + params["lin_in"]["b"]
    norm_states = []
    for blk in params["blocks"]:
        t = jnp.sin(h @ blk["lin1"]["w"] + blk["lin1"]["b"])
        t, ns, st = _ref_dataset_norm(t, blk["norm"]["weight"],
                                      blk["norm"]["stats"],
                                      blk["norm"]["step"], momentum)
        norm_states.append((ns, st))
        h = h + (t @ blk["lin2"]["w"] + blk["lin2"]["b"])
    h, ns, st = _ref_dataset_norm(h, params["norm_out"]["weight"],
                                  params["norm_out"]["stats"],
                                  params["norm_out"]["step"], momentum)
    norm_states.append((ns, st))
    out = h @ params["lin_out"]["w"] + params["lin_out"]["b"]
    return out, norm_states


if __name__ == "__main__":
    jax.config.update("jax_default_matmul_precision", "highest")
    momentum = 0.99
    key = jax.random.PRNGKey(0)
    k_dn, k_dn2, k_par, k_x = jax.random.split(key, 4)

    dn_jit = jax.jit(dataset_norm, static_argnames=("momentum", "force_tiled"))

    # --- 1. DatasetNorm, single-pass path (multiple feature tiles) ----------
    N, F = 64, 2048
    x = jax.random.normal(k_dn, (N, F), jnp.float32) * 2.0 + 0.5
    norm = _init_norm(F)
    out, new_stats, new_step = dn_jit(x, norm["weight"], norm["stats"],
                                      norm["step"], momentum=momentum)
    jax.block_until_ready(out)
    out_r, stats_r, _ = _ref_dataset_norm(x, norm["weight"], norm["stats"],
                                          norm["step"], momentum)
    assert jnp.allclose(out, out_r, atol=1e-4, rtol=1e-4)
    assert jnp.allclose(new_stats, stats_r, atol=1e-4, rtol=1e-4)
    assert int(new_step) == 1

    # --- 2. DatasetNorm, batch-tiled two-pass path (forced, small shapes) ---
    N2, F2 = 384, 256
    x2 = jax.random.normal(k_dn2, (N2, F2), jnp.float32) * 1.5 - 0.25
    norm2 = _init_norm(F2)
    out2, stats2, _ = dn_jit(x2, norm2["weight"], norm2["stats"],
                             norm2["step"], momentum=momentum,
                             force_tiled=True)
    jax.block_until_ready(out2)
    out2_r, stats2_r, _ = _ref_dataset_norm(x2, norm2["weight"],
                                            norm2["stats"], norm2["step"],
                                            momentum)
    assert jnp.allclose(out2, out2_r, atol=1e-4, rtol=1e-4)
    assert jnp.allclose(stats2, stats2_r, atol=1e-4, rtol=1e-4)

    # --- 3. Full MLP forward, fused residual blocks (default), fp32 ---------
    in_shape, out_shape, width, depth, expanded = 2, 1, 128, 3, 256
    batch = 512
    params = init_mlp(k_par, in_shape, out_shape, width, depth, expanded)
    xm = jax.random.normal(k_x, (batch, in_shape), jnp.float32)
    mlp_jit = jax.jit(mlp_forward,
                      static_argnames=("momentum", "matmul_dtype",
                                       "fuse_blocks"))
    out_ref, states_ref = _ref_mlp_forward(params, xm, momentum)

    out_p, states_p = mlp_jit(params, xm, momentum=momentum)
    jax.block_until_ready(out_p)
    assert jnp.allclose(out_p, out_ref, atol=5e-3, rtol=5e-3), \
        float(jnp.max(jnp.abs(out_p - out_ref)))
    for (s_p, st_p), (s_r, st_r) in zip(states_p, states_ref):
        assert jnp.allclose(s_p, s_r, atol=5e-3, rtol=5e-3)
        assert int(st_p) == 1 and int(st_r) == 1

    # --- 4. Unfused fallback path (exercises Pallas linear kernels) ---------
    out_u, _ = mlp_jit(params, xm, momentum=momentum, fuse_blocks=False)
    jax.block_until_ready(out_u)
    assert jnp.allclose(out_u, out_ref, atol=5e-3, rtol=5e-3), \
        float(jnp.max(jnp.abs(out_u - out_ref)))

    # --- 5. bf16 MXU-input variant (fused), loose tolerance sanity check ----
    out_b, _ = mlp_jit(params, xm, momentum=momentum,
                       matmul_dtype=jnp.bfloat16)
    jax.block_until_ready(out_b)
    assert bool(jnp.all(jnp.isfinite(out_b)))
    assert float(jnp.max(jnp.abs(out_b - out_ref))) < 0.3

    print("KERNEL_OK")
</pallas_src>

<mosaic_0001>
module attributes {stable_mosaic.version = 11 : i64} {
  func.func @_dn_single_kernel(%arg0: i32, %arg1: memref<1xf32, #tpu.memory_space<smem>>, %arg2: memref<64x1024xf32, #tpu.memory_space<vmem>>, %arg3: memref<2x1024xf32, #tpu.memory_space<vmem>>, %arg4: memref<2x1024xf32, #tpu.memory_space<vmem>>, %arg5: memref<64x1024xf32, #tpu.memory_space<vmem>>, %arg6: memref<2x1024xf32, #tpu.memory_space<vmem>>) attributes {dimension_semantics = [#tpu.dimension_semantics<parallel>], iteration_bounds = array<i64: 2>, scalar_prefetch = 0 : i64, scratch_operands = 0 : i64, tpu.core_type = #tpu.core_type<tc>, window_params = [{transform_indices = @transform_0, window_bounds = array<i64: 1>}, {transform_indices = @transform_1, window_bounds = array<i64: 64, 1024>}, {transform_indices = @transform_2, window_bounds = array<i64: 2, 1024>}, {transform_indices = @transform_3, window_bounds = array<i64: 2, 1024>}, {transform_indices = @transform_4, window_bounds = array<i64: 64, 1024>}, {transform_indices = @transform_5, window_bounds = array<i64: 2, 1024>}]} {
    %c0 = arith.constant 0 : index
    %c0_0 = arith.constant 0 : index
    %0 = vector.load %arg2[%c0, %c0_0] : memref<64x1024xf32, #tpu.memory_space<vmem>>, vector<64x1024xf32>
    %cst = arith.constant dense<0.000000e+00> : vector<1024xf32>
    %1 = vector.multi_reduction <add>, %0, %cst [0] : vector<64x1024xf32> to vector<1024xf32>
    %2 = vector.shape_cast %1 : vector<1024xf32> to vector<1x1024xf32>
    %cst_1 = arith.constant 6.400000e+01 : f32
    %3 = vector.broadcast %cst_1 : f32 to vector<1x1024xf32>
    %4 = arith.divf %2, %3 : vector<1x1024xf32>
    %5 = arith.mulf %0, %0 : vector<64x1024xf32>
    %cst_2 = arith.constant dense<0.000000e+00> : vector<1024xf32>
    %6 = vector.multi_reduction <add>, %5, %cst_2 [0] : vector<64x1024xf32> to vector<1024xf32>
    %7 = vector.shape_cast %6 : vector<1024xf32> to vector<1x1024xf32>
    %cst_3 = arith.constant 6.400000e+01 : f32
    %8 = vector.broadcast %cst_3 : f32 to vector<1x1024xf32>
    %9 = arith.divf %7, %8 : vector<1x1024xf32>
    %c0_4 = arith.constant 0 : index
    %10 = memref.load %arg1[%c0_4] : memref<1xf32, #tpu.memory_space<smem>>
    %c0_5 = arith.constant 0 : index
    %c0_6 = arith.constant 0 : index
    %11 = vector.load %arg4[%c0_5, %c0_6] : memref<2x1024xf32, #tpu.memory_space<vmem>>, vector<1x1024xf32>
    %c1 = arith.constant 1 : index
    %c0_7 = arith.constant 0 : index
    %12 = vector.load %arg4[%c1, %c0_7] : memref<2x1024xf32, #tpu.memory_space<vmem>>, vector<1x1024xf32>
    %13 = arith.subf %4, %11 : vector<1x1024xf32>
    %14 = vector.broadcast %10 : f32 to vector<1x1024xf32>
    %15 = arith.mulf %14, %13 : vector<1x1024xf32>
    %16 = arith.addf %11, %15 : vector<1x1024xf32>
    %17 = arith.subf %9, %12 : vector<1x1024xf32>
    %18 = vector.broadcast %10 : f32 to vector<1x1024xf32>
    %19 = arith.mulf %18, %17 : vector<1x1024xf32>
    %20 = arith.addf %12, %19 : vector<1x1024xf32>
    %c0_8 = arith.constant 0 : index
    %c0_9 = arith.constant 0 : index
    %21 = vector.load %arg6[%c0_8, %c0_9] : memref<2x1024xf32, #tpu.memory_space<vmem>>, vector<1x1024xf32>
    tpu.vector_store %arg6[%c0_8, %c0_9], %16 {strides = array<i32>} : memref<2x1024xf32, #tpu.memory_space<vmem>>, vector<1x1024xf32>,
    %c1_10 = arith.constant 1 : index
    %c0_11 = arith.constant 0 : index
    %22 = vector.load %arg6[%c1_10, %c0_11] : memref<2x1024xf32, #tpu.memory_space<vmem>>, vector<1x1024xf32>
    tpu.vector_store %arg6[%c1_10, %c0_11], %20 {strides = array<i32>} : memref<2x1024xf32, #tpu.memory_space<vmem>>, vector<1x1024xf32>,
    %23 = arith.mulf %16, %16 : vector<1x1024xf32>
    %24 = arith.subf %20, %23 : vector<1x1024xf32>
    %cst_12 = arith.constant 9.99999997E-7 : f32
    %25 = vector.broadcast %cst_12 : f32 to vector<1x1024xf32>
    %26 = arith.maximumf %24, %25 : vector<1x1024xf32>
    %27 = math.rsqrt %26 : vector<1x1024xf32>
    %c0_13 = arith.constant 0 : index
    %c0_14 = arith.constant 0 : index
    %28 = vector.load %arg3[%c0_13, %c0_14] : memref<2x1024xf32, #tpu.memory_space<vmem>>, vector<1x1024xf32>
    %29 = arith.mulf %28, %27 : vector<1x1024xf32>
    %c1_15 = arith.constant 1 : index
    %c0_16 = arith.constant 0 : index
    %30 = vector.load %arg3[%c1_15, %c0_16] : memref<2x1024xf32, #tpu.memory_space<vmem>>, vector<1x1024xf32>
    %31 = arith.mulf %16, %29 : vector<1x1024xf32>
    %32 = arith.subf %30, %31 : vector<1x1024xf32>
    %33 = vector.broadcast %29 : vector<1x1024xf32> to vector<64x1024xf32>
    %34 = arith.mulf %0, %33 : vector<64x1024xf32>
    %35 = vector.broadcast %32 : vector<1x1024xf32> to vector<64x1024xf32>
    %36 = arith.addf %34, %35 : vector<64x1024xf32>
    %c0_17 = arith.constant 0 : index
    %c0_18 = arith.constant 0 : index
    %37 = vector.load %arg5[%c0_17, %c0_18] : memref<64x1024xf32, #tpu.memory_space<vmem>>, vector<64x1024xf32>
    tpu.vector_store %arg5[%c0_17, %c0_18], %36 {strides = array<i32>} : memref<64x1024xf32, #tpu.memory_space<vmem>>, vector<64x1024xf32>,
    return
  }
  func.func @transform_0(%arg0: i32) -> i32 {
    %c0_i32 = arith.constant 0 : i32
    %c0_i32_0 = arith.constant 0 : i32
    return %c0_i32 : i32
  }
  func.func @transform_1(%arg0: i32) -> (i32, i32) {
    %c0_i32 = arith.constant 0 : i32
    %c0_i32_0 = arith.constant 0 : i32
    return %c0_i32, %arg0 : i32, i32
  }
  func.func @transform_2(%arg0: i32) -> (i32, i32) {
    %c0_i32 = arith.constant 0 : i32
    %c0_i32_0 = arith.constant 0 : i32
    return %c0_i32, %arg0 : i32, i32
  }
  func.func @transform_3(%arg0: i32) -> (i32, i32) {
    %c0_i32 = arith.constant 0 : i32
    %c0_i32_0 = arith.constant 0 : i32
    return %c0_i32, %arg0 : i32, i32
  }
  func.func @transform_4(%arg0: i32) -> (i32, i32) {
    %c0_i32 = arith.constant 0 : i32
    %c0_i32_0 = arith.constant 0 : i32
    return %c0_i32, %arg0 : i32, i32
  }
  func.func @transform_5(%arg0: i32) -> (i32, i32) {
    %c0_i32 = arith.constant 0 : i32
    %c0_i32_0 = arith.constant 0 : i32
    return %c0_i32, %arg0 : i32, i32
  }
}

</mosaic_0001>

<bundles_post_ra>
// kernel: dataset_norm.1
= control target key start
LH: loop header
LB: loop body
LE: loop exit
PB: predicated region body
PF: predicated region fallthrough
CT: control target
= control target key end

     0   :  { %s2625_s0 = inlined_call_operand.<no memory space> [shape: f32[1], index: 0, kind: input, shape index: {}]   ;;  %s2626_s1 = inlined_call_operand.hbm [shape: f32[64,2048], index: 1, kind: input, shape index: {}]   ;;  %s2627_s2 = inlined_call_operand.vmem [shape: f32[2,2048], index: 2, kind: input, shape index: {}]   ;;  %s2628_s3 = inlined_call_operand.vmem [shape: f32[2,2048], index: 3, kind: input, shape index: {}, may-alias: {3,5}]   ;;  %s2629_s4 = inlined_call_operand.hbm [shape: f32[64,2048], index: 4, kind: output, shape index: {0}]   ;;  %s2630_s5 = inlined_call_operand.vmem [shape: f32[2,2048], index: 5, kind: output, shape index: {1}, may-alias: {3,5}]  }
   0x1   :  { %11 = sst [smem:[#allocation2]] %s2625_s0 }
   0x2   :  { %12 = vsyncpa [#allocation4], 0 }
   0x3   :  { %14 = vsyncpa [#allocation4 + $0x1], 0 }
   0x4   :  { %15 = vsyncpa [#allocation5], 0 }
   0x5   :  { %17 = vsyncpa [#allocation5 + $0x1], 0  ;;  %s1547_s20 = smov 0   ;;  %s1549_s21 = smov 0  }
   0x6   :  { %s1551_s22 = smov 0   ;;  %s1553_s23 = smov 0  }
   0x7 LB: > { %s1568_s0 = sadd.s32 4294967295, %s1503_s23   ;;  %s1326_s24 = sadd.s32 4294967294, %s1503_s23   ;;  %s1503_s23 = sphi %s1553_s23, %s2949_s23   ;;  %s1499_s22 = sphi %s1551_s22, %s2948_s22   ;;  %s1495_s21 = sphi %s1549_s21, %s2947_s21   ;;  %s1491_s20 = sphi %s1547_s20, %s2946_s20  }
   0x8   : > { %s1572_s25 = sadd.s32 1, %s1503_s23   ;;  %s51_s26 = sadd.s32 1, %s1499_s22 }
   0x9   : > { %s48_s27 = ssub.s32 %s1503_s23, %s1572_s25  ;;  %p58_p0 = scmp.ne.s32.totalorder %s1499_s22, %s1495_s21 }
   0xa   : > { %p49_p1 = scmp.eq.s32.totalorder %s48_s27, 0  ;;  %p59_p2 = scmp.eq.s32.totalorder %s1503_s23, 0 }
   0xb   : > { %p64_p3 = scmp.ne.s32.totalorder %s1495_s21, %s1491_s20  ;;  %p65_p4 = scmp.eq.s32.totalorder %s1568_s0, 0 }
   0xc   : > { %s1584_s28 = scalar_select %p49_p1, %s1499_s22, %s51_s26  }
   0xd   : > { %p1586_p5 = por %p59_p2, %p58_p0  ;;  %p1590_p6 = por %p65_p4, %p64_p3 }
   0xe   : > { %p140_p7 = scmp.eq.s32.totalorder %s1568_s0, 1  ;;  %p146_p8 = scmp.eq.s32.totalorder %s1326_s24, 1 }
   0xf   : > { %p1363_p10 = scmp.lt.s32.totalorder %s1503_s23, 2  ;;  %s195_s8 = sand.u32 1, %s1499_s22  }
  0x10   : > { %p1597_p11 = por %p140_p7, %p58_p0  ;;  %p1601_p12 = por %p146_p8, %p64_p3 }
  0x11   : > { %s1349_s9 = sshll.u32 %s1503_s23, 10  ;;  %s1329_s10 = sshll.u32 %s195_s8, 9 }
  0x12   : > { %s2715_s6 = scalar_select %p1597_p11, 1, 0 }
  0x13   : > { %s2716_s7 = scalar_select %p1601_p12, 1, 0 }
  0x14   : > { %s1610_s13 = scalar_lea.hbm %s2626_s1, %s1349_s9  ;;  %s199_s14 = scalar_lea.vmem [#allocation3], %s1329_s10 }
  0x15   : > { %s206_s15 = sshll.u32 %s199_s14, 4  ;;  %p1614_p13 = pnand %p1363_p10, %p1586_p5  ;;  %s1618_s15 = int_to_ptr.vmem [resolvable:$true] %s206_s15 }
  0x16   : > { %s1621_s17 = scalar_lea.sflag [#allocation4], %s195_s8  ;;  %s1407_s18 = scalar_lea.hbm %s1610_s13, 8192 }
  0x17   : > { %p1408_p1 = scmp.ne.s32.totalorder %s1610_s13, %s1407_s18  ;;  %p1409_p2 = pneg %p1614_p13 }
  0x18   : > { %s1412_s26 = scalar_lea.hbm %s2626_s1, 16384  ;;  %p1413_p5 = scmp.lt.u32.totalorder %s1610_s13, %s2626_s1 }
  0x19   : > { %p1410_p3 = pnand %p1409_p2, %p1408_p1  ;;  %p1414_p7 = scmp.lt.u32.totalorder %s1412_s26, %s1407_s18 }
  0x1a   : > { %p1416_p10 = scmp.lt.u32.totalorder %s1407_s18, %s1610_s13 }
  0x1b   : > { %p1411_p4 = pneg %p1410_p3  ;;  %p1415_p8 = por %p1414_p7, %p1413_p5 }
  0x1d   : > { %p1417_p9 = por %p1416_p10, %p1415_p8 }
  0x1f   : > { %p1418_p0 = pnand %p1417_p9, %p1411_p4 }
  0x21   : > { %1421 = shalt.err (!%p1418_p0)
}
  0x22   : > { %s1422_s8 = scalar_lea.vmem %s1618_s15, 8192  ;;  %s1505_s9 = smov [#allocation3]  }
  0x23   : > { %p1423_p1 = scmp.ne.s32.totalorder %s1618_s15, %s1422_s8  ;;  %s1427_s10 = sshll.u32 %s1505_s9, 4  ;;  %s1428_s10 = int_to_ptr.vmem [resolvable:$false] %s1427_s10 }
  0x24   : > { %s1429_s11 = scalar_lea.vmem %s1428_s10, 16384  ;;  %p1430_p11 = scmp.lt.s32.totalorder %s1618_s15, %s1428_s10 }
  0x25   : > { %p1425_p3 = pnand %p1423_p1, %p1409_p2  ;;  %p1431_p5 = scmp.lt.s32.totalorder %s1429_s11, %s1422_s8 }
  0x27   : > { %p1426_p12 = pneg %p1425_p3  ;;  %p1432_p7 = por %p1431_p5, %p1430_p11 }
  0x29   : > { %p1433_p8 = pnand %p1432_p7, %p1426_p12 }
  0x2b   : > { %1436 = shalt.err (!%p1433_p8)
}
  0x2c   : > { %s1506_s12 = smov 2048   ;;  %s1507_s14 = smov 1024  }
  0x2d   : > { %s1508_s18 = smov 64   ;;  %p232_p9 = scmp.lt.s32.totalorder %s1503_s23, 3 }
  0x2e   : > { %1358 = dma.hbm_to_vmem [thread:$0]  (!%p1614_p13), %s1610_s13, 8192, %s1618_s15, %s1621_s17, %s1506_s12, %s1507_s14, %s1508_s18  }
  0x2f   : > { %p2718_p0 = scmp.ge.s32.totalorder %s1503_s23, 1 }
  0x31   : > { %p233_p2 = pnand %p2718_p0, %p232_p9 }
  0x33   : > { %236 = sbr.rel (%p233_p2) target bundleno = 272 (0x110), region = 36 }
  0x3a   : > { %s1653_s19 = sand.u32 1, %s1495_s21  }
  0x3b   : > { %s1333_s24 = sshll.u32 %s1653_s19, 9  ;;  %s239_s26 = scalar_lea.sflag [#allocation4], %s1653_s19 }
  0x3c   : > { %s1659_s27 = scalar_lea.vmem [#allocation3], %s1333_s24 }
  0x3d   : > { %1482 = dma.done.wait (%p1590_p6), %s239_s26, 8192  }
  0x3e   : > { %1484 = vsyncadd (%p1590_p6), %s239_s26, 4294959104  ;;  %v662_v0 = vlaneseq  ;;  %s657_s13 = sld [smem:[#allocation2]]  ;;  %v1509_v1 = vmov 1966171168   ;;  %v1676_v10 = vld [vmem:[%s1659_s27] sm:$0xff]  ;;  %v1679_v11 = vld [vmem:[%s1659_s27 + $0x8] sm:$0xff] }
  0x3f   : > { %v732_v2 = vunpack.c.l.s4 %v1509_v1  ;;  %2724 = vst [vmem:[#allocation14_spill] sm:$0xff] %v1676_v10  ;;  %2725 = vst [vmem:[#allocation15_spill] sm:$0xff] %v1679_v11  ;;  %v1682_v12 = vld [vmem:[%s1659_s27 + $0x10] sm:$0xff]  ;;  %v1691_v16 = vld [vmem:[%s1659_s27 + $0x18] sm:$0xff]  ;;  %v1701_v19 = vmul.f32 %v1676_v10, %v1676_v10  ;;  %v1705_v20 = vmul.f32 %v1679_v11, %v1679_v11  ;;  %s1335_s30 = sshll.u32 %s1568_s0, 3  ;;  %s2336_s26 = scalar_lea.vmem [#allocation6], %s1333_s24 }
  0x40   : > { %v663_v3 = vshrl.u32 %v662_v0, 7  ;;  %2726 = vst [vmem:[#allocation16_spill] sm:$0xff] %v1682_v12  ;;  %2730 = vst [vmem:[#allocation20_spill] sm:$0xff] %v1691_v16  ;;  %v1694_v17 = vld [vmem:[%s1659_s27 + $0x20] sm:$0xff]  ;;  %v1697_v18 = vld [vmem:[%s1659_s27 + $0x28] sm:$0xff]  ;;  %v1722_v26 = vmul.f32 %v1682_v12, %v1682_v12  ;;  %v1726_v27 = vmul.f32 %v1691_v16, %v1691_v16  ;;  %p2166_p6 = scmp.lt.s32.totalorder %s1335_s30, 15 }
  0x41   : > { %v733_v4 = vunpack.c.0.s8 %v732_v2  ;;  %2731 = vst [vmem:[#allocation21_spill] sm:$0xff] %v1694_v17  ;;  %2732 = vst [vmem:[#allocation22_spill] sm:$0xff] %v1697_v18  ;;  %v1712_v23 = vld [vmem:[%s1659_s27 + $0x30] sm:$0xff]  ;;  %v1715_v24 = vld [vmem:[%s1659_s27 + $0x38] sm:$0xff]  ;;  %v1730_v28 = vmul.f32 %v1694_v17, %v1694_v17  ;;  %v1734_v29 = vmul.f32 %v1697_v18, %v1697_v18  ;;  %s1350_s24 = sshll.u32 %s1568_s0, 10  ;;  %p2943_p12 = scmp.ne.s32.totalorder %s2715_s6, 0 }
  0x42   : > { %v1665_v5 = vsub.s32 0, %v663_v3  ;;  %v1667_v6 = vsub.s32 1, %v663_v3  ;;  %v1669_v7 = vsub.s32 2, %v663_v3  ;;  %v1671_v8 = vsub.s32 3, %v663_v3  ;;  %2733 = vst [vmem:[#allocation23_spill] sm:$0xff] %v1701_v19  ;;  %2734 = vst [vmem:[#allocation24_spill] sm:$0xff] %v1705_v20  ;;  %s2573_s15 = scalar_lea.hbm %s2629_s4, %s1350_s24 }
  0x43   : > { %v1673_v9 = vsub.s32 4, %v663_v3  ;;  %v1684_v13 = vsub.s32 5, %v663_v3  ;;  %v1686_v14 = vsub.s32 6, %v663_v3  ;;  %v1688_v15 = vsub.s32 7, %v663_v3  ;;  %2737 = vst [vmem:[#allocation27_spill] sm:$0xff] %v1712_v23  ;;  %2738 = vst [vmem:[#allocation28_spill] sm:$0xff] %v1715_v24 }
  0x44   : > { %2719 = vst [vmem:[#allocation9_spill] sm:$0xff] %v1665_v5  ;;  %2720 = vst [vmem:[#allocation10_spill] sm:$0xff] %v1667_v6  ;;  %v1707_v21 = vstv %s657_s13  ;;  %v1709_v22 = vsub.s32 %v733_v4, %v663_v3  ;;  %v1718_v25 = vld [vmem:[%s1659_s27 + $0x40] sm:$0xff]  ;;  %v1737_v30 = vld [vmem:[%s1659_s27 + $0x48] sm:$0xff]  ;;  %v1749_v34 = vmul.f32 %v1712_v23, %v1712_v23  ;;  %v1753_v35 = vmul.f32 %v1715_v24, %v1715_v24  ;;  %s2951_s30 = smov (!%p2166_p6, %s1335_s30), 15  ;;  %s1200_s13 = sshll.u32 %s2336_s26, 4  ;;  %s2579_s13 = int_to_ptr.vmem [resolvable:$true] %s1200_s13 }
  0x45   : > { %2721 = vst [vmem:[#allocation11_spill] sm:$0xff] %v1669_v7  ;;  %2722 = vst [vmem:[#allocation12_spill] sm:$0xff] %v1671_v8  ;;  %v1740_v31 = vld [vmem:[%s1659_s27 + $0x50] sm:$0xff]  ;;  %v1743_v32 = vld [vmem:[%s1659_s27 + $0x58] sm:$0xff]  ;;  %v368_v33 = vadd.f32 %v1718_v25, %v1676_v10  ;;  %v1757_v36 = vmul.f32 %v1718_v25, %v1718_v25  ;;  %v381_v40 = vadd.f32 %v1737_v30, %v1679_v11  ;;  %s2174_s16 = sshll.u32 %s2951_s30, 1  ;;  %s1510_s17 = smov [#allocation6]  }
  0x46   : > { %2723 = vst [vmem:[#allocation13_spill] sm:$0xff] %v1673_v9  ;;  %2727 = vst [vmem:[#allocation17_spill] sm:$0xff] %v1684_v13  ;;  %v1760_v37 = vld [vmem:[%s1659_s27 + $0x60] sm:$0xff]  ;;  %v1763_v38 = vld [vmem:[%s1659_s27 + $0x68] sm:$0xff]  ;;  %v394_v41 = vadd.f32 %v1740_v31, %v1682_v12  ;;  %v407_v42 = vadd.f32 %v1743_v32, %v1691_v16  ;;  %v1776_v43 = vmul.f32 %v1737_v30, %v1737_v30  ;;  %s2180_s8 = scalar_lea.vmem %s2628_s3, %s2174_s16  ;;  %s302_s11 = scalar_lea.vmem %s2630_s5, %s2174_s16 }
  0x47   : > { %2728 = vst [vmem:[#allocation18_spill] sm:$0xff] %v1686_v14  ;;  %2729 = vst [vmem:[#allocation19_spill] sm:$0xff] %v1688_v15  ;;  %v1766_v39 = vld [vmem:[%s1659_s27 + $0x70] sm:$0xff]  ;;  %v1779_v44 = vld [vmem:[%s1659_s27 + $0x78] sm:$0xff]  ;;  %v420_v47 = vadd.f32 %v1760_v37, %v1694_v17  ;;  %v433_v48 = vadd.f32 %v1763_v38, %v1697_v18  ;;  %v1795_v50 = vmul.f32 %v1740_v31, %v1740_v31  ;;  %s289_s18 = scalar_lea.vmem %s2627_s2, %s2174_s16  ;;  %s1437_s16 = scalar_lea.vmem %s2579_s13, 8192 }
  0x48   : > { %2735 = vst [vmem:[#allocation25_spill] sm:$0xff] %v1707_v21  ;;  %2736 = vst [vmem:[#allocation26_spill] sm:$0xff] %v1709_v22  ;;  %v1782_v45 = vld [vmem:[%s1659_s27 + $0x80] sm:$0xff]  ;;  %v1785_v46 = vld [vmem:[%s1659_s27 + $0x88] sm:$0xff]  ;;  %v446_v49 = vadd.f32 %v1766_v39, %v1712_v23  ;;  %v459_v56 = vadd.f32 %v1779_v44, %v1715_v24  ;;  %v1812_v57 = vmul.f32 %v1743_v32, %v1743_v32  ;;  %p1438_p11 = scmp.ne.s32.totalorder %s2579_s13, %s1437_s16  ;;  %s1441_s29 = sshll.u32 %s1510_s17, 4  ;;  %s1442_s29 = int_to_ptr.vmem [resolvable:$false] %s1441_s29 }
  0x49   : > { %2739 = vst [vmem:[#allocation29_spill] sm:$0xff] %v1718_v25  ;;  %2740 = vst [vmem:[#allocation30_spill] sm:$0xff] %v1722_v26  ;;  %v1798_v51 = vld [vmem:[%s1659_s27 + $0x90] sm:$0xff]  ;;  %v1801_v52 = vld [vmem:[%s1659_s27 + $0x98] sm:$0xff]  ;;  %v369_v54 = vadd.f32 %v368_v33, %v1782_v45  ;;  %v382_v55 = vadd.f32 %v381_v40, %v1785_v46  ;;  %v1828_v0 = vmul.f32 %v1760_v37, %v1760_v37  ;;  %p1444_p10 = scmp.lt.s32.totalorder %s2579_s13, %s1442_s29 }
  0x4a   : > { %2741 = vst [vmem:[#allocation31_spill] sm:$0xff] %v1726_v27  ;;  %2742 = vst [vmem:[#allocation32_spill] sm:$0xff] %v1730_v28  ;;  %v1804_v53 = vld [vmem:[%s1659_s27 + $0xa0] sm:$0xff]  ;;  %v1815_v58 = vld [vmem:[%s1659_s27 + $0xa8] sm:$0xff]  ;;  %v395_v61 = vadd.f32 %v394_v41, %v1798_v51  ;;  %v408_v62 = vadd.f32 %v407_v42, %v1801_v52  ;;  %v1844_v41 = vmul.f32 %v1763_v38, %v1763_v38  ;;  %p1439_p13 = pnand %p1438_p11, %p2943_p12 }
  0x4b   : > { %2743 = vst [vmem:[#allocation33_spill] sm:$0xff] %v1734_v29  ;;  %2744 = vst [vmem:[#allocation34_spill] sm:$0xff] %v1737_v30  ;;  %v1818_v59 = vld [vmem:[%s1659_s27 + $0xb0] sm:$0xff]  ;;  %v1821_v60 = vld [vmem:[%s1659_s27 + $0xb8] sm:$0xff]  ;;  %v421_v63 = vadd.f32 %v420_v47, %v1804_v53  ;;  %v434_v4 = vadd.f32 %v433_v48, %v1815_v58 }
  0x4c   : > { %2745 = vst [vmem:[#allocation35_spill] sm:$0xff] %v1740_v31  ;;  %2746 = vst [vmem:[#allocation36_spill] sm:$0xff] %v1743_v32  ;;  %v1831_v1 = vld [vmem:[%s1659_s27 + $0xc0] sm:$0xff]  ;;  %v1834_v2 = vld [vmem:[%s1659_s27 + $0xc8] sm:$0xff]  ;;  %v447_v33 = vadd.f32 %v446_v49, %v1818_v59  ;;  %v460_v40 = vadd.f32 %v459_v56, %v1821_v60  ;;  %v1860_v56 = vmul.f32 %v1766_v39, %v1766_v39  ;;  %p1440_p4 = pneg %p1439_p13 }
  0x4d   : > { %2747 = vst [vmem:[#allocation37_spill] sm:$0xff] %v1749_v34  ;;  %2748 = vst [vmem:[#allocation38_spill] sm:$0xff] %v1753_v35  ;;  %v1837_v3 = vld [vmem:[%s1659_s27 + $0xd0] sm:$0xff]  ;;  %v1847_v42 = vld [vmem:[%s1659_s27 + $0xd8] sm:$0xff]  ;;  %v370_v32 = vadd.f32 %v369_v54, %v1831_v1  ;;  %v383_v48 = vadd.f32 %v382_v55, %v1834_v2 }
  0x4e   : > { %2749 = vst [vmem:[#allocation39_spill] sm:$0xff] %v1757_v36  ;;  %2750 = vst [vmem:[#allocation40_spill] sm:$0xff] %v1760_v37  ;;  %v1850_v47 = vld [vmem:[%s1659_s27 + $0xe0] sm:$0xff]  ;;  %v1853_v37 = vld [vmem:[%s1659_s27 + $0xe8] sm:$0xff]  ;;  %v396_v49 = vadd.f32 %v395_v61, %v1837_v3  ;;  %v409_v25 = vadd.f32 %v408_v62, %v1847_v42  ;;  %v1876_v61 = vmul.f32 %v1779_v44, %v1779_v44 }
  0x4f   : > { %2751 = vst [vmem:[#allocation41_spill] sm:$0xff] %v1763_v38  ;;  %2752 = vst [vmem:[#allocation42_spill] sm:$0xff] %v1766_v39  ;;  %v1863_v38 = vld [vmem:[%s1659_s27 + $0xf0] sm:$0xff]  ;;  %v1866_v31 = vld [vmem:[%s1659_s27 + $0xf8] sm:$0xff]  ;;  %v422_v54 = vadd.f32 %v421_v63, %v1850_v47  ;;  %v435_v55 = vadd.f32 %v434_v4, %v1853_v37  ;;  %v1892_v4 = vmul.f32 %v1782_v45, %v1782_v45 }
  0x50   : > { %2753 = vst [vmem:[#allocation43_spill] sm:$0xff] %v1776_v43  ;;  %2754 = vst [vmem:[#allocation44_spill] sm:$0xff] %v1779_v44  ;;  %v1869_v30 = vld [vmem:[%s1659_s27 + $0x100] sm:$0xff]  ;;  %v1879_v39 = vld [vmem:[%s1659_s27 + $0x108] sm:$0xff]  ;;  %v448_v62 = vadd.f32 %v447_v33, %v1863_v38  ;;  %v461_v63 = vadd.f32 %v460_v40, %v1866_v31  ;;  %v1908_v40 = vmul.f32 %v1785_v46, %v1785_v46 }
  0x51   : > { %2755 = vst [vmem:[#allocation45_spill] sm:$0xff] %v1782_v45  ;;  %2756 = vst [vmem:[#allocation46_spill] sm:$0xff] %v1785_v46  ;;  %v1882_v24 = vld [vmem:[%s1659_s27 + $0x110] sm:$0xff]  ;;  %v1885_v23 = vld [vmem:[%s1659_s27 + $0x118] sm:$0xff]  ;;  %v371_v18 = vadd.f32 %v370_v32, %v1869_v30  ;;  %v384_v12 = vadd.f32 %v383_v48, %v1879_v39 }
  0x52   : > { %2757 = vst [vmem:[#allocation47_spill] sm:$0xff] %v1795_v50  ;;  %2758 = vst [vmem:[#allocation48_spill] sm:$0xff] %v1798_v51  ;;  %v1895_v44 = vld [vmem:[%s1659_s27 + $0x120] sm:$0xff]  ;;  %v1898_v17 = vld [vmem:[%s1659_s27 + $0x128] sm:$0xff]  ;;  %v397_v32 = vadd.f32 %v396_v49, %v1882_v24  ;;  %v410_v33 = vadd.f32 %v409_v25, %v1885_v23  ;;  %v1924_v25 = vmul.f32 %v1798_v51, %v1798_v51 }
  0x53   : > { %2759 = vst [vmem:[#allocation49_spill] sm:$0xff] %v1801_v52  ;;  %2760 = vst [vmem:[#allocation50_spill] sm:$0xff] %v1804_v53  ;;  %v1901_v16 = vld [vmem:[%s1659_s27 + $0x130] sm:$0xff]  ;;  %v1911_v45 = vld [vmem:[%s1659_s27 + $0x138] sm:$0xff]  ;;  %v423_v22 = vadd.f32 %v422_v54, %v1895_v44  ;;  %v436_v48 = vadd.f32 %v435_v55, %v1898_v17 }
  0x54   : > { %2761 = vst [vmem:[#allocation51_spill] sm:$0xff] %v1812_v57  ;;  %2762 = vst [vmem:[#allocation52_spill] sm:$0xff] %v1815_v58  ;;  %v1914_v11 = vld [vmem:[%s1659_s27 + $0x140] sm:$0xff]  ;;  %v1917_v10 = vld [vmem:[%s1659_s27 + $0x148] sm:$0xff]  ;;  %v449_v49 = vadd.f32 %v448_v62, %v1901_v16  ;;  %v462_v55 = vadd.f32 %v461_v63, %v1911_v45  ;;  %v1940_v62 = vmul.f32 %v1801_v52, %v1801_v52 }
  0x55   : > { %2763 = vst [vmem:[#allocation53_spill] sm:$0xff] %v1818_v59  ;;  %2764 = vst [vmem:[#allocation54_spill] sm:$0xff] %v1821_v60  ;;  %v1927_v46 = vld [vmem:[%s1659_s27 + $0x150] sm:$0xff]  ;;  %v1930_v21 = vld [vmem:[%s1659_s27 + $0x158] sm:$0xff]  ;;  %v372_v14 = vadd.f32 %v371_v18, %v1914_v11  ;;  %v385_v54 = vadd.f32 %v384_v12, %v1917_v10  ;;  %v1956_v63 = vmul.f32 %v1804_v53, %v1804_v53 }
  0x56   : > { %2765 = vst [vmem:[#allocation55_spill] sm:$0xff] %v1828_v0  ;;  %2766 = vst [vmem:[#allocation56_spill] sm:$0xff] %v1831_v1  ;;  %v1933_v15 = vld [vmem:[%s1659_s27 + $0x160] sm:$0xff]  ;;  %v1943_v51 = vld [vmem:[%s1659_s27 + $0x168] sm:$0xff]  ;;  %v398_v8 = vadd.f32 %v397_v32, %v1927_v46  ;;  %v411_v18 = vadd.f32 %v410_v33, %v1930_v21 }
  0x57   : > { %2767 = vst [vmem:[#allocation57_spill] sm:$0xff] %v1834_v2  ;;  %2768 = vst [vmem:[#allocation58_spill] sm:$0xff] %v1837_v3  ;;  %v1946_v13 = vld [vmem:[%s1659_s27 + $0x170] sm:$0xff]  ;;  %v1949_v9 = vld [vmem:[%s1659_s27 + $0x178] sm:$0xff]  ;;  %v424_v12 = vadd.f32 %v423_v22, %v1933_v15  ;;  %v437_v5 = vadd.f32 %v436_v48, %v1943_v51  ;;  %v1972_v22 = vmul.f32 %v1815_v58, %v1815_v58 }
  0x58   : > { %2769 = vst [vmem:[#allocation59_spill] sm:$0xff] %v1844_v41  ;;  %2770 = vst [vmem:[#allocation60_spill] sm:$0xff] %v1847_v42  ;;  %v1959_v52 = vld [vmem:[%s1659_s27 + $0x180] sm:$0xff]  ;;  %v1962_v7 = vld [vmem:[%s1659_s27 + $0x188] sm:$0xff]  ;;  %v450_v32 = vadd.f32 %v449_v49, %v1946_v13  ;;  %v463_v33 = vadd.f32 %v462_v55, %v1949_v9  ;;  %v1988_v55 = vmul.f32 %v1818_v59, %v1818_v59 }
  0x59   : > { %2771 = vst [vmem:[#allocation61_spill] sm:$0xff] %v1850_v47  ;;  %2772 = vst [vmem:[#allocation62_spill] sm:$0xff] %v1853_v37  ;;  %v1965_v6 = vld [vmem:[%s1659_s27 + $0x190] sm:$0xff]  ;;  %v1975_v53 = vld [vmem:[%s1659_s27 + $0x198] sm:$0xff]  ;;  %v386_v48 = vadd.f32 %v385_v54, %v1962_v7 }
  0x5a   : > { %2773 = vst [vmem:[#allocation63_spill] sm:$0xff] %v1860_v56  ;;  %2774 = vst [vmem:[#allocation64_spill] sm:$0xff] %v1863_v38  ;;  %v399_v49 = vadd.f32 %v398_v8, %v1965_v6  ;;  %v1991_v58 = vld [vmem:[%s1659_s27 + $0x1b0] sm:$0xff]  ;;  %v412_v35 = vadd.f32 %v411_v18, %v1975_v53  ;;  %v2004_v8 = vmul.f32 %v1821_v60, %v1821_v60  ;;  %v2007_v59 = vld [vmem:[%s1659_s27 + $0x1c8] sm:$0xff] }
  0x5b   : > { %2775 = vst [vmem:[#allocation65_spill] sm:$0xff] %v1866_v31  ;;  %2776 = vst [vmem:[#allocation66_spill] sm:$0xff] %v1869_v30  ;;  %v2013_v56 = vld [vmem:[%s1659_s27 + $0x1d8] sm:$0xff]  ;;  %v2026_v60 = vld [vmem:[%s1659_s27 + $0x1e8] sm:$0xff] }
  0x5c   : > { %2777 = vst [vmem:[#allocation67_spill] sm:$0xff] %v1876_v61  ;;  %2778 = vst [vmem:[#allocation68_spill] sm:$0xff] %v1879_v39  ;;  %v1997_v61 = vld [vmem:[%s1659_s27 + $0x1c0] sm:$0xff] }
  0x5d   : > { %2779 = vst [vmem:[#allocation69_spill] sm:$0xff] %v1882_v24  ;;  %2780 = vst [vmem:[#allocation70_spill] sm:$0xff] %v1885_v23 }
  0x5e   : > { %2781 = vst [vmem:[#allocation71_spill] sm:$0xff] %v1892_v4  ;;  %2782 = vst [vmem:[#allocation72_spill] sm:$0xff] %v1895_v44  ;;  %v387_v4 = vadd.f32 %v386_v48, %v2007_v59 }
  0x5f   : > { %2783 = vst [vmem:[#allocation73_spill] sm:$0xff] %v1898_v17  ;;  %2784 = vst [vmem:[#allocation74_spill] sm:$0xff] %v1901_v16 }
  0x60   : > { %2785 = vst [vmem:[#allocation75_spill] sm:$0xff] %v1908_v40  ;;  %2786 = vst [vmem:[#allocation76_spill] sm:$0xff] %v1911_v45  ;;  %v451_v40 = vadd.f32 %v450_v32, %v1991_v58  ;;  %v2036_v32 = vmul.f32 %v1834_v2, %v1834_v2  ;;  %v388_v28 = vrot.slane %v387_v4, 4 }
  0x61   : > { %2787 = vst [vmem:[#allocation77_spill] sm:$0xff] %v1914_v11  ;;  %2788 = vst [vmem:[#allocation78_spill] sm:$0xff] %v1917_v10 }
  0x62   : > { %2789 = vst [vmem:[#allocation79_spill] sm:$0xff] %v1924_v25  ;;  %2790 = vst [vmem:[#allocation80_spill] sm:$0xff] %v1927_v46  ;;  %v373_v25 = vadd.f32 %v372_v14, %v1959_v52  ;;  %v389_v2 = vadd.f32 %v388_v28, %v387_v4 }
  0x63   : > { %2791 = vst [vmem:[#allocation81_spill] sm:$0xff] %v1930_v21  ;;  %2792 = vst [vmem:[#allocation82_spill] sm:$0xff] %v1933_v15 }
  0x64   : > { %2793 = vst [vmem:[#allocation83_spill] sm:$0xff] %v1940_v62  ;;  %2794 = vst [vmem:[#allocation84_spill] sm:$0xff] %v1943_v51  ;;  %v1981_v62 = vld [vmem:[%s1659_s27 + $0x1a8] sm:$0xff]  ;;  %v374_v34 = vadd.f32 %v373_v25, %v1997_v61  ;;  %v413_v25 = vadd.f32 %v412_v35, %v2013_v56 }
  0x65   : > { %2795 = vst [vmem:[#allocation85_spill] sm:$0xff] %v1946_v13  ;;  %2796 = vst [vmem:[#allocation86_spill] sm:$0xff] %v1949_v9  ;;  %v438_v54 = vadd.f32 %v437_v5, %v1981_v62  ;;  %v2020_v5 = vmul.f32 %v1831_v1, %v1831_v1 }
  0x66   : > { %2797 = vst [vmem:[#allocation87_spill] sm:$0xff] %v1956_v63  ;;  %2798 = vst [vmem:[#allocation88_spill] sm:$0xff] %v1959_v52  ;;  %v1978_v63 = vld [vmem:[%s1659_s27 + $0x1a0] sm:$0xff]  ;;  %v375_v1 = vrot.slane %v374_v34, 4  ;;  %v414_v48 = vrot.slane %v413_v25, 4 }
  0x67   : > { %2799 = vst [vmem:[#allocation89_spill] sm:$0xff] %v1962_v7  ;;  %2800 = vst [vmem:[#allocation90_spill] sm:$0xff] %v1965_v6  ;;  %v425_v14 = vadd.f32 %v424_v12, %v1978_v63  ;;  %v2023_v12 = vld [vmem:[%s1659_s27 + $0x1e0] sm:$0xff]  ;;  %v439_v29 = vadd.f32 %v438_v54, %v2026_v60  ;;  %v390_v54 = vrot.slane %v389_v2, 2 }
  0x68   : > { %2801 = vst [vmem:[#allocation91_spill] sm:$0xff] %v1972_v22  ;;  %2802 = vst [vmem:[#allocation92_spill] sm:$0xff] %v1975_v53  ;;  %v1994_v22 = vld [vmem:[%s1659_s27 + $0x1b8] sm:$0xff]  ;;  %v376_v27 = vadd.f32 %v375_v1, %v374_v34  ;;  %v415_v43 = vadd.f32 %v414_v48, %v413_v25 }
  0x69   : > { %2803 = vst [vmem:[#allocation93_spill] sm:$0xff] %v1978_v63  ;;  %2804 = vst [vmem:[#allocation94_spill] sm:$0xff] %v1981_v62  ;;  %v464_v18 = vadd.f32 %v463_v33, %v1994_v22  ;;  %v2039_v33 = vld [vmem:[%s1659_s27 + $0x1f8] sm:$0xff]  ;;  %v440_v50 = vrot.slane %v439_v29, 4  ;;  %v391_v34 = vadd.f32 %v390_v54, %v389_v2  ;;  %v508_v54 = vmul.f32 %v1847_v42, %v1847_v42 }
  0x6a   : > { %2805 = vst [vmem:[#allocation95_spill] sm:$0xff] %v1988_v55  ;;  %2806 = vst [vmem:[#allocation96_spill] sm:$0xff] %v1991_v58  ;;  %v2010_v55 = vld [vmem:[%s1659_s27 + $0x1d0] sm:$0xff]  ;;  %v377_v36 = vrot.slane %v376_v27, 2 }
  0x6b   : > { %2807 = vst [vmem:[#allocation97_spill] sm:$0xff] %v1994_v22  ;;  %2808 = vst [vmem:[#allocation98_spill] sm:$0xff] %v1997_v61  ;;  %v400_v41 = vadd.f32 %v399_v49, %v2010_v55  ;;  %v465_v49 = vadd.f32 %v464_v18, %v2039_v33  ;;  %v392_v25 = vrot.slane %v391_v34, 1 }
  0x6c   : > { %2809 = vst [vmem:[#allocation99_spill] sm:$0xff] %v2004_v8  ;;  %2810 = vst [vmem:[#allocation100_spill] sm:$0xff] %v2007_v59  ;;  %v2029_v8 = vld [vmem:[%s1659_s27 + $0x1f0] sm:$0xff] }
  0x6d   : > { %2811 = vst [vmem:[#allocation101_spill] sm:$0xff] %v2010_v55  ;;  %2812 = vst [vmem:[#allocation102_spill] sm:$0xff] %v2013_v56  ;;  %v452_v0 = vadd.f32 %v451_v40, %v2029_v8  ;;  %v401_v57 = vrot.slane %v400_v41, 4  ;;  %v466_v20 = vrot.slane %v465_v49, 4  ;;  %v416_v40 = vrot.slane %v415_v43, 2 }
  0x6e   : > { %2813 = vst [vmem:[#allocation103_spill] sm:$0xff] %v2020_v5  ;;  %2814 = vst [vmem:[#allocation104_spill] sm:$0xff] %v2023_v12  ;;  %v426_v5 = vadd.f32 %v425_v14, %v2023_v12  ;;  %v441_v14 = vadd.f32 %v440_v50, %v439_v29  ;;  %v378_v56 = vadd.f32 %v377_v36, %v376_v27 }
  0x6f   : > { %2815 = vst [vmem:[#allocation105_spill] sm:$0xff] %v2026_v60  ;;  %2816 = vst [vmem:[#allocation106_spill] sm:$0xff] %v2029_v8  ;;  %v453_v26 = vrot.slane %v452_v0, 4  ;;  %v467_v8 = vadd.f32 %v466_v20, %v465_v49  ;;  %v393_v27 = vadd.f32 %v392_v25, %v391_v34  ;;  %v511_v34 = vmul.f32 %v1863_v38, %v1863_v38  ;;  %v2841_v38 = vld [vmem:[#allocation31_spill] sm:$0xff] }
  0x70   : > { %2817 = vst [vmem:[#allocation107_spill] sm:$0xff] %v2036_v32  ;;  %2818 = vst [vmem:[#allocation108_spill] sm:$0xff] %v2039_v33  ;;  %v427_v35 = vrot.slane %v426_v5, 4  ;;  %v402_v32 = vadd.f32 %v401_v57, %v400_v41  ;;  %v442_v59 = vrot.slane %v441_v14, 2  ;;  %v417_v33 = vadd.f32 %v416_v40, %v415_v43 }
  0x71   : > { %v454_v12 = vadd.f32 %v453_v26, %v452_v0  ;;  %v468_v61 = vrot.slane %v467_v8, 2  ;;  %v379_v28 = vrot.slane %v378_v56, 1  ;;  %v509_v40 = vmul.f32 %v1850_v47, %v1850_v47  ;;  %v2843_v47 = vld [vmem:[#allocation32_spill] sm:$0xff] }
  0x72   : > { %v428_v19 = vadd.f32 %v427_v35, %v426_v5  ;;  %v403_v60 = vrot.slane %v402_v32, 2  ;;  %v443_v41 = vadd.f32 %v442_v59, %v441_v14  ;;  %v418_v29 = vrot.slane %v417_v33, 1 }
  0x73   : > { %v455_v18 = vrot.slane %v454_v12, 2  ;;  %v469_v26 = vadd.f32 %v468_v61, %v467_v8  ;;  %v380_v50 = vadd.f32 %v379_v28, %v378_v56  ;;  %v2047_v59 = vmul.f32 0.015625, %v393_v27 }
  0x74   : > { %v429_v55 = vrot.slane %v428_v19, 2  ;;  %v404_v1 = vadd.f32 %v403_v60, %v402_v32  ;;  %v444_v48 = vrot.slane %v443_v41, 1  ;;  %v419_v49 = vadd.f32 %v418_v29, %v417_v33 }
  0x75   : > { %v456_v4 = vadd.f32 %v455_v18, %v454_v12  ;;  %v470_v35 = vrot.slane %v469_v26, 1  ;;  %v2045_v32 = vmul.f32 0.015625, %v380_v50  ;;  %2820 = vst [vmem:[#allocation110_spill] sm:$0xff] %v2047_v59  ;;  %v507_v33 = vmul.f32 %v1837_v3, %v1837_v3  ;;  %v2845_v3 = vld [vmem:[#allocation33_spill] sm:$0xff]  ;;  %v2854_v59 = vld [vmem:[#allocation83_spill] sm:$0xff] }
  0x76   : > { %v430_v57 = vadd.f32 %v429_v55, %v428_v19  ;;  %v405_v5 = vrot.slane %v404_v1, 1  ;;  %v445_v60 = vadd.f32 %v444_v48, %v443_v41  ;;  %v2051_v12 = vmul.f32 0.015625, %v419_v49 }
  0x77   : > { %v457_v20 = vrot.slane %v456_v4, 1  ;;  %2819 = vst [vmem:[#allocation109_spill] sm:$0xff] %v2045_v32  ;;  %v471_v19 = vadd.f32 %v470_v35, %v469_v26  ;;  %v510_v18 = vmul.f32 %v1853_v37, %v1853_v37  ;;  %v513_v28 = vmul.f32 %v1869_v30, %v1869_v30  ;;  %v2839_v30 = vld [vmem:[#allocation30_spill] sm:$0xff] }
  0x78   : > { %v431_v0 = vrot.slane %v430_v57, 1  ;;  %v406_v36 = vadd.f32 %v405_v5, %v404_v1  ;;  %2822 = vst [vmem:[#allocation112_spill] sm:$0xff] %v2051_v12  ;;  %v2055_v61 = vmul.f32 0.015625, %v445_v60  ;;  %v512_v1 = vmul.f32 %v1866_v31, %v1866_v31 }
  0x79   : > { %v458_v43 = vadd.f32 %v457_v20, %v456_v4  ;;  %v2061_v14 = vmul.f32 0.015625, %v471_v19  ;;  %v515_v41 = vmul.f32 %v1882_v24, %v1882_v24  ;;  %v516_v4 = vmul.f32 %v1885_v23, %v1885_v23  ;;  %v2837_v24 = vld [vmem:[#allocation24_spill] sm:$0xff] }
  0x7a   : > { %v432_v2 = vadd.f32 %v431_v0, %v430_v57  ;;  %v2049_v55 = vmul.f32 0.015625, %v406_v36  ;;  %2824 = vst [vmem:[#allocation114_spill] sm:$0xff] %v2055_v61  ;;  %v514_v57 = vmul.f32 %v1879_v39, %v1879_v39  ;;  %v517_v25 = vmul.f32 %v1895_v44, %v1895_v44  ;;  %v2835_v44 = vld [vmem:[#allocation23_spill] sm:$0xff] }
  0x7b   : > { %v2057_v8 = vmul.f32 0.015625, %v458_v43  ;;  %2826 = vst [vmem:[#allocation116_spill] sm:$0xff] %v2061_v14  ;;  %v518_v5 = vmul.f32 %v1898_v17, %v1898_v17  ;;  %v519_v29 = vmul.f32 %v1901_v16, %v1901_v16  ;;  %v520_v26 = vmul.f32 %v1911_v45, %v1911_v45  ;;  %v2832_v45 = vld [vmem:[#allocation105_spill] sm:$0xff]  ;;  %v2833_v16 = vld [vmem:[#allocation106_spill] sm:$0xff]  ;;  %v2834_v17 = vld [vmem:[#allocation108_spill] sm:$0xff] }
  0x7c   : > { %2821 = vst [vmem:[#allocation111_spill] sm:$0xff] %v2049_v55  ;;  %v2053_v56 = vmul.f32 0.015625, %v432_v2  ;;  %v521_v50 = vmul.f32 %v1914_v11, %v1914_v11  ;;  %v522_v0 = vmul.f32 %v1917_v10, %v1917_v10  ;;  %v523_v48 = vmul.f32 %v1927_v46, %v1927_v46  ;;  %v2829_v46 = vld [vmem:[#allocation101_spill] sm:$0xff]  ;;  %v2830_v10 = vld [vmem:[#allocation102_spill] sm:$0xff]  ;;  %v2831_v11 = vld [vmem:[#allocation104_spill] sm:$0xff] }
  0x7d   : > { %2825 = vst [vmem:[#allocation115_spill] sm:$0xff] %v2057_v8  ;;  %v524_v20 = vmul.f32 %v1930_v21, %v1930_v21  ;;  %v525_v27 = vmul.f32 %v1933_v15, %v1933_v15  ;;  %v526_v36 = vmul.f32 %v1943_v51, %v1943_v51  ;;  %v527_v49 = vmul.f32 %v1946_v13, %v1946_v13  ;;  %v2827_v15 = vld [vmem:[#allocation98_spill] sm:$0xff]  ;;  %v2828_v21 = vld [vmem:[#allocation100_spill] sm:$0xff]  ;;  %v2847_v8 = vld [vmem:[#allocation71_spill] sm:$0xff] }
  0x7e   : > { %2823 = vst [vmem:[#allocation113_spill] sm:$0xff] %v2053_v56  ;;  %v528_v35 = vmul.f32 %v1949_v9, %v1949_v9  ;;  %v529_v2 = vmul.f32 %v1959_v52, %v1959_v52  ;;  %v530_v60 = vmul.f32 %v1962_v7, %v1962_v7  ;;  %v531_v43 = vmul.f32 %v1965_v6, %v1965_v6  ;;  %v2848_v61 = vld [vmem:[#allocation75_spill] sm:$0xff] }
  0x7f   : > { %v532_v19 = vmul.f32 %v1975_v53, %v1975_v53  ;;  %v533_v51 = vmul.f32 %v1978_v63, %v1978_v63  ;;  %v534_v13 = vmul.f32 %v1981_v62, %v1981_v62  ;;  %v535_v9 = vmul.f32 %v1991_v58, %v1991_v58 }
  0x80   : > { %v536_v52 = vmul.f32 %v1994_v22, %v1994_v22  ;;  %v537_v7 = vmul.f32 %v2827_v15, %v2827_v15  ;;  %v538_v6 = vmul.f32 %v2828_v21, %v2828_v21  ;;  %v539_v53 = vmul.f32 %v2829_v46, %v2829_v46  ;;  %v2836_v21 = vld [vmem:[#allocation39_spill] sm:$0xff] }
  0x81   : > { %v540_v63 = vmul.f32 %v2830_v10, %v2830_v10  ;;  %v541_v62 = vmul.f32 %v2831_v11, %v2831_v11  ;;  %v542_v58 = vmul.f32 %v2832_v45, %v2832_v45  ;;  %v543_v22 = vmul.f32 %v2833_v16, %v2833_v16  ;;  %v2838_v46 = vld [vmem:[#allocation43_spill] sm:$0xff] }
  0x82   : > { %v544_v15 = vmul.f32 %v2834_v17, %v2834_v17  ;;  %v545_v23 = vadd.f32 %v2836_v21, %v2835_v44  ;;  %v558_v39 = vadd.f32 %v2838_v46, %v2837_v24  ;;  %v2840_v10 = vld [vmem:[#allocation47_spill] sm:$0xff]  ;;  %v2849_v21 = vld [vmem:[#allocation37_spill] sm:$0xff]  ;;  %v2851_v24 = vld [vmem:[#allocation38_spill] sm:$0xff] }
  0x83   : > { %v571_v31 = vadd.f32 %v2840_v10, %v2839_v30  ;;  %v2842_v11 = vld [vmem:[#allocation51_spill] sm:$0xff] }
  0x84   : > { %v584_v37 = vadd.f32 %v2842_v11, %v2841_v38  ;;  %v2844_v45 = vld [vmem:[#allocation55_spill] sm:$0xff]  ;;  %v546_v17 = vadd.f32 %v545_v23, %v2847_v8  ;;  %v559_v56 = vadd.f32 %v558_v39, %v2848_v61 }
  0x85   : > { %v597_v42 = vadd.f32 %v2844_v45, %v2843_v47  ;;  %v2846_v16 = vld [vmem:[#allocation59_spill] sm:$0xff] }
  0x86   : > { %v610_v14 = vadd.f32 %v2846_v16, %v2845_v3  ;;  %v2850_v44 = vld [vmem:[#allocation63_spill] sm:$0xff]  ;;  %v585_v11 = vadd.f32 %v584_v37, %v2854_v59 }
  0x87   : > { %v623_v12 = vadd.f32 %v2850_v44, %v2849_v21  ;;  %v2852_v46 = vld [vmem:[#allocation67_spill] sm:$0xff] }
  0x88   : > { %v636_v55 = vadd.f32 %v2852_v46, %v2851_v24  ;;  %v2853_v10 = vld [vmem:[#allocation79_spill] sm:$0xff]  ;;  %v586_v46 = vadd.f32 %v585_v11, %v508_v54 }
  0x89   : > { %v572_v30 = vadd.f32 %v571_v31, %v2853_v10  ;;  %v2855_v38 = vld [vmem:[#allocation87_spill] sm:$0xff] }
  0x8a   : > { %v598_v32 = vadd.f32 %v597_v42, %v2855_v38  ;;  %v2856_v45 = vld [vmem:[#allocation91_spill] sm:$0xff] }
  0x8b   : > { %v611_v47 = vadd.f32 %v610_v14, %v2856_v45  ;;  %v2857_v3 = vld [vmem:[#allocation103_spill] sm:$0xff]  ;;  %v573_v24 = vadd.f32 %v572_v30, %v507_v33  ;;  %v587_v45 = vadd.f32 %v586_v46, %v516_v4 }
  0x8c   : > { %v547_v16 = vadd.f32 %v546_v17, %v2857_v3  ;;  %v2858_v8 = vld [vmem:[#allocation107_spill] sm:$0xff]  ;;  %v599_v10 = vadd.f32 %v598_v32, %v509_v40 }
  0x8d   : > { %v560_v23 = vadd.f32 %v559_v56, %v2858_v8  ;;  %v2859_v39 = vld [vmem:[#allocation95_spill] sm:$0xff]  ;;  %v612_v31 = vadd.f32 %v611_v47, %v510_v18  ;;  %v574_v14 = vadd.f32 %v573_v24, %v515_v41 }
  0x8e   : > { %v624_v61 = vadd.f32 %v623_v12, %v2859_v39  ;;  %v2860_v21 = vld [vmem:[#allocation99_spill] sm:$0xff]  ;;  %v548_v37 = vadd.f32 %v547_v16, %v513_v28  ;;  %v600_v3 = vadd.f32 %v599_v10, %v517_v25 }
  0x8f   : > { %v637_v44 = vadd.f32 %v636_v55, %v2860_v21  ;;  %v561_v59 = vadd.f32 %v560_v23, %v514_v57  ;;  %v613_v17 = vadd.f32 %v612_v31, %v518_v5  ;;  %v575_v21 = vadd.f32 %v574_v14, %v523_v48 }
  0x90   : > { %v625_v38 = vadd.f32 %v624_v61, %v511_v34  ;;  %v549_v8 = vadd.f32 %v548_v37, %v521_v50  ;;  %v588_v55 = vadd.f32 %v587_v45, %v524_v20  ;;  %v601_v33 = vadd.f32 %v600_v3, %v525_v27 }
  0x91   : > { %v638_v42 = vadd.f32 %v637_v44, %v512_v1  ;;  %v562_v56 = vadd.f32 %v561_v59, %v522_v0  ;;  %v614_v54 = vadd.f32 %v613_v17, %v526_v36  ;;  %v576_v34 = vadd.f32 %v575_v21, %v531_v43 }
  0x92   : > { %v626_v12 = vadd.f32 %v625_v38, %v519_v29  ;;  %v550_v32 = vadd.f32 %v549_v8, %v529_v2  ;;  %v589_v1 = vadd.f32 %v588_v55, %v532_v19  ;;  %v602_v57 = vadd.f32 %v601_v33, %v533_v51 }
  0x93   : > { %v639_v39 = vadd.f32 %v638_v42, %v520_v26  ;;  %v563_v40 = vadd.f32 %v562_v56, %v530_v60  ;;  %v615_v41 = vadd.f32 %v614_v54, %v534_v13  ;;  %v577_v26 = vadd.f32 %v576_v34, %v539_v53 }
  0x94   : > { %v627_v18 = vadd.f32 %v626_v12, %v527_v49  ;;  %v551_v4 = vadd.f32 %v550_v32, %v537_v7  ;;  %v590_v50 = vadd.f32 %v589_v1, %v540_v63  ;;  %v603_v0 = vadd.f32 %v602_v57, %v541_v62  ;;  %v2183_v32 = vld [vmem:[%s2180_s8] ss:$2 sm:$0xff] }
  0x95   : > { %v640_v28 = vadd.f32 %v639_v39, %v528_v35  ;;  %v564_v25 = vadd.f32 %v563_v40, %v538_v6  ;;  %v616_v48 = vadd.f32 %v615_v41, %v542_v58  ;;  %v578_v35 = vrot.slane %v577_v26, 4 }
  0x96   : > { %v628_v5 = vadd.f32 %v627_v18, %v535_v9  ;;  %v552_v20 = vrot.slane %v551_v4, 4  ;;  %v591_v2 = vrot.slane %v590_v50, 4  ;;  %v604_v60 = vrot.slane %v603_v0, 4 }
  0x97   : > { %v641_v29 = vadd.f32 %v640_v28, %v536_v52  ;;  %v565_v27 = vrot.slane %v564_v25, 4  ;;  %v617_v51 = vrot.slane %v616_v48, 4  ;;  %v579_v52 = vadd.f32 %v578_v35, %v577_v26 }
  0x98   : > { %v629_v36 = vadd.f32 %v628_v5, %v543_v22  ;;  %v553_v13 = vadd.f32 %v552_v20, %v551_v4  ;;  %v592_v53 = vadd.f32 %v591_v2, %v590_v50  ;;  %v605_v63 = vadd.f32 %v604_v60, %v603_v0  ;;  %v2863_v50 = vld [vmem:[#allocation10_spill] sm:$0xff]  ;;  %v2867_v2 = vld [vmem:[#allocation17_spill] sm:$0xff] }
  0x99   : > { %v642_v49 = vadd.f32 %v641_v29, %v544_v15  ;;  %v566_v7 = vadd.f32 %v565_v27, %v564_v25  ;;  %v618_v62 = vadd.f32 %v617_v51, %v616_v48  ;;  %v580_v15 = vrot.slane %v579_v52, 2  ;;  %v2862_v29 = vld [vmem:[#allocation9_spill] sm:$0xff]  ;;  %v2864_v48 = vld [vmem:[#allocation11_spill] sm:$0xff]  ;;  %v2865_v27 = vld [vmem:[#allocation12_spill] sm:$0xff] }
  0x9a   : > { %v630_v6 = vrot.slane %v629_v36, 4  ;;  %v554_v58 = vrot.slane %v553_v13, 2  ;;  %v593_v30 = vrot.slane %v592_v53, 2  ;;  %v606_v11 = vrot.slane %v605_v63, 2  ;;  %v2868_v51 = vld [vmem:[#allocation18_spill] sm:$0xff] }
  0x9b   : > { %v643_v9 = vrot.slane %v642_v49, 4  ;;  %v567_v43 = vrot.slane %v566_v7, 2  ;;  %v619_v47 = vrot.slane %v618_v62, 2  ;;  %v581_v24 = vadd.f32 %v580_v15, %v579_v52  ;;  %v2874_v15 = vld [vmem:[#allocation113_spill] sm:$0xff] }
  0x9c   : > { %v631_v19 = vadd.f32 %v630_v6, %v629_v36  ;;  %v555_v16 = vadd.f32 %v554_v58, %v553_v13  ;;  %v594_v46 = vadd.f32 %v593_v30, %v592_v53  ;;  %v607_v10 = vadd.f32 %v606_v11, %v605_v63  ;;  %v2871_v53 = vld [vmem:[#allocation110_spill] sm:$0xff]  ;;  %v2872_v58 = vld [vmem:[#allocation111_spill] sm:$0xff] }
  0x9d   : > { %v644_v22 = vadd.f32 %v643_v9, %v642_v49  ;;  %v568_v23 = vadd.f32 %v567_v43, %v566_v7  ;;  %v620_v31 = vadd.f32 %v619_v47, %v618_v62  ;;  %v582_v14 = vrot.slane %v581_v24, 1  ;;  %v2866_v49 = vld [vmem:[#allocation13_spill] sm:$0xff]  ;;  %v2869_v7 = vld [vmem:[#allocation19_spill] sm:$0xff]  ;;  %v2875_v11 = vld [vmem:[#allocation114_spill] sm:$0xff] }
  0x9e   : > { %v632_v61 = vrot.slane %v631_v19, 2  ;;  %v556_v37 = vrot.slane %v555_v16, 1  ;;  %v595_v45 = vrot.slane %v594_v46, 1  ;;  %v608_v3 = vrot.slane %v607_v10, 1  ;;  %v2870_v9 = vld [vmem:[#allocation109_spill] sm:$0xff] }
  0x9f   : > { %v645_v44 = vrot.slane %v644_v22, 2  ;;  %v569_v59 = vrot.slane %v568_v23, 1  ;;  %v621_v17 = vrot.slane %v620_v31, 1  ;;  %v583_v21 = vadd.f32 %v582_v14, %v581_v24  ;;  %v2204_v62 = vld [vmem:[%s2180_s8 + $0x1] ss:$2 sm:$0xff]  ;;  %s1443_s8 = scalar_lea.vmem %s1442_s29, 16384 }
  0xa0   : > { %v633_v38 = vadd.f32 %v632_v61, %v631_v19  ;;  %v557_v8 = vadd.f32 %v556_v37, %v555_v16  ;;  %v596_v55 = vadd.f32 %v595_v45, %v594_v46  ;;  %v609_v33 = vadd.f32 %v608_v3, %v607_v10  ;;  %v2873_v19 = vld [vmem:[#allocation112_spill] sm:$0xff]  ;;  %v2876_v16 = vld [vmem:[#allocation115_spill] sm:$0xff]  ;;  %v2878_v24 = vld [vmem:[#allocation25_spill] sm:$0xff]  ;;  %p1445_p1 = scmp.lt.s32.totalorder %s1443_s8, %s1437_s16 }
  0xa1   : > { %v646_v42 = vadd.f32 %v645_v44, %v644_v22  ;;  %v570_v56 = vadd.f32 %v569_v59, %v568_v23  ;;  %v622_v54 = vadd.f32 %v621_v17, %v620_v31  ;;  %v651_v1 = vmul.f32 0.015625, %v583_v21  ;;  %v2877_v61 = vld [vmem:[#allocation116_spill] sm:$0xff]  ;;  %v2879_v21 = vld [vmem:[#allocation26_spill] sm:$0xff] }
  0xa2   : > { %v634_v12 = vrot.slane %v633_v38, 1  ;;  %v649_v28 = vmul.f32 0.015625, %v557_v8  ;;  %v652_v57 = vmul.f32 0.015625, %v596_v55  ;;  %v653_v41 = vmul.f32 0.015625, %v609_v33  ;;  %p1446_p3 = por %p1445_p1, %p1444_p10 }
  0xa3   : > { %v647_v39 = vrot.slane %v646_v42, 1  ;;  %v650_v34 = vmul.f32 0.015625, %v570_v56  ;;  %v654_v4 = vmul.f32 0.015625, %v622_v54  ;;  %v665_v26 = vrot.slane %v2183_v32, %v2862_v29 }
  0xa4   : > { %v635_v40 = vadd.f32 %v634_v12, %v633_v38  ;;  %v669_v0 = vrot.slane %v2183_v32, %v2863_v50  ;;  %v673_v20 = vrot.slane %v2183_v32, %v2864_v48  ;;  %v677_v36 = vrot.slane %v2183_v32, %v2865_v27  ;;  %p1447_p5 = pnand %p1446_p3, %p1440_p4 }
  0xa5   : > { %v648_v18 = vadd.f32 %v647_v39, %v646_v42  ;;  %v681_v35 = vrot.slane %v2183_v32, %v2866_v49  ;;  %v685_v60 = vrot.slane %v2183_v32, %v2867_v2  ;;  %v689_v13 = vrot.slane %v2183_v32, %v2868_v51 }
  0xa6   : > { %v655_v25 = vmul.f32 0.015625, %v635_v40  ;;  %v693_v6 = vrot.slane %v2183_v32, %v2869_v7  ;;  %v702_v52 = vsub.f32 %v2870_v9, %v665_v26  ;;  %v703_v63 = vsub.f32 %v2871_v53, %v669_v0 }
  0xa7   : > { %v656_v5 = vmul.f32 0.015625, %v648_v18  ;;  %v704_v43 = vsub.f32 %v2872_v58, %v673_v20  ;;  %v705_v22 = vsub.f32 %v2873_v19, %v677_v36  ;;  %v706_v30 = vsub.f32 %v2874_v15, %v681_v35 }
  0xa8   : > { %v707_v47 = vsub.f32 %v2875_v11, %v685_v60  ;;  %v708_v23 = vsub.f32 %v2876_v16, %v689_v13  ;;  %v709_v44 = vsub.f32 %v2877_v61, %v693_v6  ;;  %v711_v46 = vmul.f32 %v2878_v24, %v702_v52 }
  0xa9   : > { %v712_v10 = vmul.f32 %v2878_v24, %v703_v63  ;;  %v713_v31 = vmul.f32 %v2878_v24, %v704_v43  ;;  %v714_v37 = vmul.f32 %v2878_v24, %v705_v22  ;;  %v715_v59 = vmul.f32 %v2878_v24, %v706_v30 }
  0xaa   : > { %v716_v38 = vmul.f32 %v2878_v24, %v707_v47  ;;  %v717_v42 = vmul.f32 %v2878_v24, %v708_v23  ;;  %v718_v14 = vmul.f32 %v2878_v24, %v709_v44  ;;  %v782_v3 = vrot.slane %v2204_v62, %v2862_v29 }
  0xab   : > { %v727_v45 = vcombine.low %v711_v46, %v712_v10  ;;  %v728_v17 = vcombine.low %v713_v31, %v714_v37  ;;  %v786_v56 = vrot.slane %v2204_v62, %v2863_v50  ;;  %v790_v12 = vrot.slane %v2204_v62, %v2864_v48 }
  0xac   : > { %v729_v8 = vcombine.low %v715_v59, %v716_v38  ;;  %v730_v39 = vcombine.low %v717_v42, %v718_v14  ;;  %v794_v33 = vrot.slane %v2204_v62, %v2865_v27  ;;  %v798_v54 = vrot.slane %v2204_v62, %v2866_v49 }
  0xad   : > { %v737_v55 = vrot.slane %v727_v45, %v2879_v21  ;;  %v744_v40 = vrot.slane %v728_v17, %v2879_v21  ;;  %v802_v26 = vrot.slane %v2204_v62, %v2867_v2  ;;  %v806_v0 = vrot.slane %v2204_v62, %v2868_v51 }
  0xae   : > { %v751_v18 = vrot.slane %v729_v8, %v2879_v21  ;;  %v758_v20 = vrot.slane %v730_v39, %v2879_v21  ;;  %v810_v36 = vrot.slane %v2204_v62, %v2869_v7  ;;  %v819_v35 = vsub.f32 %v649_v28, %v782_v3  ;;  %v901_v3 = vld [vmem:[%s289_s18] ss:$2 sm:$0xff] }
  0xaf   : > { %v820_v60 = vsub.f32 %v650_v34, %v786_v56  ;;  %v759_v13 = vcombine.low %v737_v55, %v744_v40  ;;  %v821_v6 = vsub.f32 %v651_v1, %v790_v12  ;;  %v822_v9 = vsub.f32 %v652_v57, %v794_v33  ;;  %v1343_v56 = vld [vmem:[%s289_s18 + $0x1] ss:$2 sm:$0xff] }
  0xb0   : > { %v823_v52 = vsub.f32 %v653_v41, %v798_v54  ;;  %v760_v53 = vcombine.low %v751_v18, %v758_v20  ;;  %v824_v63 = vsub.f32 %v654_v4, %v802_v26  ;;  %v825_v58 = vsub.f32 %v655_v25, %v806_v0  ;;  %v2880_v26 = vld [vmem:[#allocation14_spill] sm:$0xff]  ;;  %v2881_v20 = vld [vmem:[#allocation15_spill] sm:$0xff] }
  0xb1   : > { %v826_v43 = vsub.f32 %v656_v5, %v810_v36  ;;  %v767_v19 = vrot.slane %v759_v13, %v2879_v21  ;;  %v827_v22 = vmul.f32 %v819_v35, %v2878_v24  ;;  %v828_v15 = vmul.f32 %v820_v60, %v2878_v24  ;;  %v2882_v35 = vld [vmem:[#allocation16_spill] sm:$0xff] }
  0xb2   : > { %v829_v30 = vmul.f32 %v821_v6, %v2878_v24  ;;  %v774_v28 = vrot.slane %v760_v53, %v2879_v21  ;;  %v830_v34 = vmul.f32 %v822_v9, %v2878_v24  ;;  %v831_v1 = vmul.f32 %v823_v52, %v2878_v24  ;;  %v2883_v13 = vld [vmem:[#allocation20_spill] sm:$0xff]  ;;  %v2884_v9 = vld [vmem:[#allocation21_spill] sm:$0xff]  ;;  %v2885_v53 = vld [vmem:[#allocation22_spill] sm:$0xff] }
  0xb3   : > { %v832_v57 = vmul.f32 %v824_v63, %v2878_v24  ;;  %v833_v41 = vmul.f32 %v825_v58, %v2878_v24  ;;  %v834_v4 = vmul.f32 %v826_v43, %v2878_v24  ;;  %v843_v25 = vcombine.low %v827_v22, %v828_v15  ;;  %v2886_v58 = vld [vmem:[#allocation27_spill] sm:$0xff] }
  0xb4   : > { %v775_v5 = vcombine.low %v767_v19, %v774_v28  ;;  %v844_v11 = vcombine.low %v829_v30, %v830_v34 }
  0xb5   : > { %v845_v47 = vcombine.low %v831_v1, %v832_v57  ;;  %v846_v16 = vcombine.low %v833_v41, %v834_v4  ;;  %v853_v23 = vrot.slane %v843_v25, %v2879_v21  ;;  %v2887_v4 = vld [vmem:[#allocation28_spill] sm:$0xff] }
  0xb6   : > { %v777_v61 = vadd.f32 %v775_v5, %v2183_v32  ;;  %v860_v44 = vrot.slane %v844_v11, %v2879_v21  ;;  %v2888_v5 = vld [vmem:[#allocation29_spill] sm:$0xff] }
  0xb7   : > { %v867_v46 = vrot.slane %v845_v47, %v2879_v21  ;;  %v874_v24 = vrot.slane %v846_v16, %v2879_v21  ;;  %v2889_v47 = vld [vmem:[#allocation34_spill] sm:$0xff] }
  0xb8   : > { %v875_v10 = vcombine.low %v853_v23, %v860_v44  ;;  %894 = vst [vmem:[%s302_s11] ss:$2 sm:$0xff] %v777_v61  ;;  %v897_v42 = vmul.f32 %v777_v61, %v777_v61  ;;  %v2890_v23 = vld [vmem:[#allocation35_spill] sm:$0xff]  ;;  %v2891_v44 = vld [vmem:[#allocation36_spill] sm:$0xff] }
  0xb9   : > { %v876_v31 = vcombine.low %v867_v46, %v874_v24  ;;  %v2892_v46 = vld [vmem:[#allocation40_spill] sm:$0xff] }
  0xba   : > { %v883_v37 = vrot.slane %v875_v10, %v2879_v21  ;;  %v2893_v10 = vld [vmem:[#allocation41_spill] sm:$0xff] }
  0xbb   : > { %v890_v59 = vrot.slane %v876_v31, %v2879_v21 }
  0xbd   : > { %v891_v38 = vcombine.low %v883_v37, %v890_v59  ;;  %v2894_v37 = vld [vmem:[#allocation42_spill] sm:$0xff] }
  0xbf   : > { %v893_v14 = vadd.f32 %v2204_v62, %v891_v38 }
  0xc1   : > { %v898_v45 = vsub.f32 %v893_v14, %v897_v42  ;;  %1342 = vst [vmem:[%s302_s11 + $0x1] ss:$2 sm:$0xff] %v893_v14 }
  0xc3   : > { %v899_v32 = vmax.f32 %v898_v45, 1e-06 }
  0xc5   : > { %1404 = vrsqrt.f32 %v899_v32 }
  0xcf   : > { %v1405_v17 = vpop.eup %1404 }
  0xd0   : > { %v902_v8 = vmul.f32 %v1405_v17, %v901_v3 }
  0xd2   : > { %v905_v12 = vmul.f32 %v902_v8, %v777_v61  ;;  %v2267_v39 = vrot.slane %v902_v8, %v2862_v29  ;;  %v2270_v21 = vrot.slane %v902_v8, %v2863_v50  ;;  %v2273_v62 = vrot.slane %v902_v8, %v2864_v48 }
  0xd3   : > { %v2276_v55 = vrot.slane %v902_v8, %v2865_v27  ;;  %v2279_v33 = vrot.slane %v902_v8, %v2866_v49  ;;  %v2282_v54 = vrot.slane %v902_v8, %v2867_v2  ;;  %v2285_v40 = vrot.slane %v902_v8, %v2868_v51 }
  0xd4   : > { %v906_v18 = vsub.f32 %v1343_v56, %v905_v12  ;;  %v948_v0 = vmul.f32 %v2267_v39, %v2880_v26  ;;  %v949_v36 = vmul.f32 %v2270_v21, %v2881_v20  ;;  %v950_v60 = vmul.f32 %v2273_v62, %v2882_v35  ;;  %v2895_v56 = vld [vmem:[#allocation44_spill] sm:$0xff] }
  0xd5   : > { %v951_v6 = vmul.f32 %v2276_v55, %v2883_v13  ;;  %v952_v52 = vmul.f32 %v2279_v33, %v2884_v9  ;;  %v953_v63 = vmul.f32 %v2282_v54, %v2885_v53  ;;  %v954_v43 = vmul.f32 %v2285_v40, %v2886_v58 }
  0xd6   : > { %v2302_v19 = vrot.slane %v906_v18, %v2862_v29  ;;  %v2305_v22 = vrot.slane %v906_v18, %v2863_v50  ;;  %v2308_v15 = vrot.slane %v906_v18, %v2864_v48  ;;  %v2311_v30 = vrot.slane %v906_v18, %v2865_v27 }
  0xd7   : > { %v2314_v28 = vrot.slane %v906_v18, %v2866_v49  ;;  %v2317_v34 = vrot.slane %v906_v18, %v2867_v2  ;;  %v2320_v1 = vrot.slane %v906_v18, %v2868_v51  ;;  %v2323_v29 = vrot.slane %v902_v8, %v2869_v7 }
  0xd8   : > { %v1053_v50 = vadd.f32 %v2302_v19, %v948_v0  ;;  %v1054_v48 = vadd.f32 %v2305_v22, %v949_v36  ;;  %v1055_v57 = vadd.f32 %v2308_v15, %v950_v60  ;;  %v1056_v27 = vadd.f32 %v2311_v30, %v951_v6  ;;  %v2897_v0 = vld [vmem:[#allocation46_spill] sm:$0xff]  ;;  %v2898_v36 = vld [vmem:[#allocation48_spill] sm:$0xff]  ;;  %v2899_v60 = vld [vmem:[#allocation49_spill] sm:$0xff] }
  0xd9   : > { %v1057_v49 = vadd.f32 %v2314_v28, %v952_v52  ;;  %v1058_v41 = vadd.f32 %v2317_v34, %v953_v63  ;;  %v1059_v2 = vadd.f32 %v2320_v1, %v954_v43  ;;  %v955_v51 = vmul.f32 %v2323_v29, %v2887_v4  ;;  %v2900_v6 = vld [vmem:[#allocation50_spill] sm:$0xff]  ;;  %v2901_v52 = vld [vmem:[#allocation52_spill] sm:$0xff]  ;;  %v2902_v63 = vld [vmem:[#allocation53_spill] sm:$0xff] }
  0xda   : > { %1117 = vst [vmem:[%s2336_s26] sm:$0xff] %v1053_v50  ;;  %1118 = vst [vmem:[%s2336_s26 + $0x8] sm:$0xff] %v1054_v48  ;;  %v2343_v25 = vrot.slane %v906_v18, %v2869_v7  ;;  %v956_v11 = vmul.f32 %v2267_v39, %v2888_v5  ;;  %v957_v16 = vmul.f32 %v2270_v21, %v2889_v47  ;;  %v2896_v18 = vld [vmem:[#allocation45_spill] sm:$0xff]  ;;  %v2903_v4 = vld [vmem:[#allocation54_spill] sm:$0xff] }
  0xdb   : > { %1119 = vst [vmem:[%s2336_s26 + $0x10] sm:$0xff] %v1055_v57  ;;  %1120 = vst [vmem:[%s2336_s26 + $0x18] sm:$0xff] %v1056_v27  ;;  %v958_v61 = vmul.f32 %v2273_v62, %v2890_v23  ;;  %v959_v7 = vmul.f32 %v2276_v55, %v2891_v44  ;;  %v960_v24 = vmul.f32 %v2279_v33, %v2892_v46  ;;  %v2904_v5 = vld [vmem:[#allocation56_spill] sm:$0xff]  ;;  %v2905_v47 = vld [vmem:[#allocation57_spill] sm:$0xff] }
  0xdc   : > { %1121 = vst [vmem:[%s2336_s26 + $0x20] sm:$0xff] %v1057_v49  ;;  %1122 = vst [vmem:[%s2336_s26 + $0x28] sm:$0xff] %v1058_v41  ;;  %v961_v31 = vmul.f32 %v2282_v54, %v2893_v10  ;;  %v962_v59 = vmul.f32 %v2285_v40, %v2894_v37  ;;  %v1060_v38 = vadd.f32 %v2343_v25, %v955_v51  ;;  %v2906_v23 = vld [vmem:[#allocation58_spill] sm:$0xff]  ;;  %v2907_v44 = vld [vmem:[#allocation60_spill] sm:$0xff] }
  0xdd   : > { %1123 = vst [vmem:[%s2336_s26 + $0x30] sm:$0xff] %v1059_v2  ;;  %v1061_v42 = vadd.f32 %v2302_v19, %v956_v11  ;;  %v1062_v14 = vadd.f32 %v2305_v22, %v957_v16  ;;  %v1063_v45 = vadd.f32 %v2308_v15, %v958_v61  ;;  %v1064_v32 = vadd.f32 %v2311_v30, %v959_v7  ;;  %v2908_v46 = vld [vmem:[#allocation61_spill] sm:$0xff]  ;;  %v2909_v10 = vld [vmem:[#allocation62_spill] sm:$0xff]  ;;  %v2910_v37 = vld [vmem:[#allocation64_spill] sm:$0xff] }
  0xde   : > { %v1065_v3 = vadd.f32 %v2314_v28, %v960_v24  ;;  %v1066_v17 = vadd.f32 %v2317_v34, %v961_v31  ;;  %v1067_v8 = vadd.f32 %v2320_v1, %v962_v59  ;;  %1124 = vst [vmem:[%s2336_s26 + $0x38] sm:$0xff] %v1060_v38  ;;  %v963_v12 = vmul.f32 %v2323_v29, %v2895_v56  ;;  %v2911_v56 = vld [vmem:[#allocation65_spill] sm:$0xff] }
  0xdf   : > { %1125 = vst [vmem:[%s2336_s26 + $0x40] sm:$0xff] %v1061_v42  ;;  %1126 = vst [vmem:[%s2336_s26 + $0x48] sm:$0xff] %v1062_v14  ;;  %v964_v26 = vmul.f32 %v2267_v39, %v2896_v18  ;;  %v965_v20 = vmul.f32 %v2270_v21, %v2897_v0  ;;  %v966_v35 = vmul.f32 %v2273_v62, %v2898_v36  ;;  %v2912_v18 = vld [vmem:[#allocation66_spill] sm:$0xff]  ;;  %v2913_v0 = vld [vmem:[#allocation68_spill] sm:$0xff] }
  0xe0   : > { %1127 = vst [vmem:[%s2336_s26 + $0x50] sm:$0xff] %v1063_v45  ;;  %1128 = vst [vmem:[%s2336_s26 + $0x58] sm:$0xff] %v1064_v32  ;;  %v967_v13 = vmul.f32 %v2276_v55, %v2899_v60  ;;  %v968_v9 = vmul.f32 %v2279_v33, %v2900_v6  ;;  %v969_v53 = vmul.f32 %v2282_v54, %v2901_v52  ;;  %v2914_v36 = vld [vmem:[#allocation69_spill] sm:$0xff]  ;;  %v2915_v60 = vld [vmem:[#allocation70_spill] sm:$0xff] }
  0xe1   : > { %1129 = vst [vmem:[%s2336_s26 + $0x60] sm:$0xff] %v1065_v3  ;;  %1130 = vst [vmem:[%s2336_s26 + $0x68] sm:$0xff] %v1066_v17  ;;  %v970_v58 = vmul.f32 %v2285_v40, %v2902_v63  ;;  %v1068_v43 = vadd.f32 %v2343_v25, %v963_v12  ;;  %v1069_v50 = vadd.f32 %v2302_v19, %v964_v26  ;;  %v2916_v6 = vld [vmem:[#allocation72_spill] sm:$0xff]  ;;  %v2917_v52 = vld [vmem:[#allocation73_spill] sm:$0xff] }
  0xe2   : > { %1131 = vst [vmem:[%s2336_s26 + $0x70] sm:$0xff] %v1067_v8  ;;  %v1070_v48 = vadd.f32 %v2305_v22, %v965_v20  ;;  %v1071_v57 = vadd.f32 %v2308_v15, %v966_v35  ;;  %v1072_v27 = vadd.f32 %v2311_v30, %v967_v13  ;;  %v1073_v49 = vadd.f32 %v2314_v28, %v968_v9  ;;  %v2918_v63 = vld [vmem:[#allocation74_spill] sm:$0xff] }
  0xe3   : > { %v1074_v41 = vadd.f32 %v2317_v34, %v969_v53  ;;  %v1075_v2 = vadd.f32 %v2320_v1, %v970_v58  ;;  %1132 = vst [vmem:[%s2336_s26 + $0x78] sm:$0xff] %v1068_v43  ;;  %1133 = vst [vmem:[%s2336_s26 + $0x80] sm:$0xff] %v1069_v50  ;;  %v971_v51 = vmul.f32 %v2323_v29, %v2903_v4  ;;  %v2919_v4 = vld [vmem:[#allocation76_spill] sm:$0xff] }
  0xe4   : > { %1134 = vst [vmem:[%s2336_s26 + $0x88] sm:$0xff] %v1070_v48  ;;  %1135 = vst [vmem:[%s2336_s26 + $0x90] sm:$0xff] %v1071_v57  ;;  %v972_v11 = vmul.f32 %v2267_v39, %v2904_v5  ;;  %v973_v16 = vmul.f32 %v2270_v21, %v2905_v47  ;;  %v974_v61 = vmul.f32 %v2273_v62, %v2906_v23  ;;  %v2920_v5 = vld [vmem:[#allocation77_spill] sm:$0xff]  ;;  %v2921_v47 = vld [vmem:[#allocation78_spill] sm:$0xff] }
  0xe5   : > { %1136 = vst [vmem:[%s2336_s26 + $0x98] sm:$0xff] %v1072_v27  ;;  %1137 = vst [vmem:[%s2336_s26 + $0xa0] sm:$0xff] %v1073_v49  ;;  %v975_v7 = vmul.f32 %v2276_v55, %v2907_v44  ;;  %v976_v24 = vmul.f32 %v2279_v33, %v2908_v46  ;;  %v977_v31 = vmul.f32 %v2282_v54, %v2909_v10  ;;  %v2922_v23 = vld [vmem:[#allocation80_spill] sm:$0xff]  ;;  %v2923_v44 = vld [vmem:[#allocation81_spill] sm:$0xff] }
  0xe6   : > { %1138 = vst [vmem:[%s2336_s26 + $0xa8] sm:$0xff] %v1074_v41  ;;  %1139 = vst [vmem:[%s2336_s26 + $0xb0] sm:$0xff] %v1075_v2  ;;  %v978_v59 = vmul.f32 %v2285_v40, %v2910_v37  ;;  %v1076_v38 = vadd.f32 %v2343_v25, %v971_v51  ;;  %v1077_v42 = vadd.f32 %v2302_v19, %v972_v11  ;;  %v2924_v46 = vld [vmem:[#allocation82_spill] sm:$0xff]  ;;  %v2925_v10 = vld [vmem:[#allocation84_spill] sm:$0xff] }
  0xe7   : > { %v1078_v14 = vadd.f32 %v2305_v22, %v973_v16  ;;  %v1079_v45 = vadd.f32 %v2308_v15, %v974_v61  ;;  %v1080_v32 = vadd.f32 %v2311_v30, %v975_v7  ;;  %v1081_v3 = vadd.f32 %v2314_v28, %v976_v24  ;;  %v2926_v37 = vld [vmem:[#allocation85_spill] sm:$0xff] }
  0xe8   : > { %v1082_v17 = vadd.f32 %v2317_v34, %v977_v31  ;;  %v1083_v8 = vadd.f32 %v2320_v1, %v978_v59  ;;  %1140 = vst [vmem:[%s2336_s26 + $0xb8] sm:$0xff] %v1076_v38  ;;  %1141 = vst [vmem:[%s2336_s26 + $0xc0] sm:$0xff] %v1077_v42  ;;  %v979_v12 = vmul.f32 %v2323_v29, %v2911_v56  ;;  %v2927_v56 = vld [vmem:[#allocation86_spill] sm:$0xff] }
  0xe9   : > { %1142 = vst [vmem:[%s2336_s26 + $0xc8] sm:$0xff] %v1078_v14  ;;  %1143 = vst [vmem:[%s2336_s26 + $0xd0] sm:$0xff] %v1079_v45  ;;  %v980_v26 = vmul.f32 %v2267_v39, %v2912_v18  ;;  %v981_v20 = vmul.f32 %v2270_v21, %v2913_v0  ;;  %v982_v35 = vmul.f32 %v2273_v62, %v2914_v36  ;;  %v2928_v18 = vld [vmem:[#allocation88_spill] sm:$0xff]  ;;  %v2929_v0 = vld [vmem:[#allocation89_spill] sm:$0xff] }
  0xea   : > { %1144 = vst [vmem:[%s2336_s26 + $0xd8] sm:$0xff] %v1080_v32  ;;  %1145 = vst [vmem:[%s2336_s26 + $0xe0] sm:$0xff] %v1081_v3  ;;  %v983_v13 = vmul.f32 %v2276_v55, %v2915_v60  ;;  %v984_v9 = vmul.f32 %v2279_v33, %v2916_v6  ;;  %v985_v53 = vmul.f32 %v2282_v54, %v2917_v52  ;;  %v2930_v36 = vld [vmem:[#allocation90_spill] sm:$0xff]  ;;  %v2931_v60 = vld [vmem:[#allocation92_spill] sm:$0xff] }
  0xeb   : > { %1146 = vst [vmem:[%s2336_s26 + $0xe8] sm:$0xff] %v1082_v17  ;;  %1147 = vst [vmem:[%s2336_s26 + $0xf0] sm:$0xff] %v1083_v8  ;;  %v986_v58 = vmul.f32 %v2285_v40, %v2918_v63  ;;  %v1084_v43 = vadd.f32 %v2343_v25, %v979_v12  ;;  %v1085_v50 = vadd.f32 %v2302_v19, %v980_v26  ;;  %v2932_v6 = vld [vmem:[#allocation93_spill] sm:$0xff]  ;;  %v2933_v52 = vld [vmem:[#allocation94_spill] sm:$0xff] }
  0xec   : > { %v1086_v48 = vadd.f32 %v2305_v22, %v981_v20  ;;  %v1087_v57 = vadd.f32 %v2308_v15, %v982_v35  ;;  %v1088_v27 = vadd.f32 %v2311_v30, %v983_v13  ;;  %v1089_v49 = vadd.f32 %v2314_v28, %v984_v9  ;;  %v2934_v63 = vld [vmem:[#allocation96_spill] sm:$0xff] }
  0xed   : > { %v1090_v41 = vadd.f32 %v2317_v34, %v985_v53  ;;  %v1091_v2 = vadd.f32 %v2320_v1, %v986_v58  ;;  %1148 = vst [vmem:[%s2336_s26 + $0xf8] sm:$0xff] %v1084_v43  ;;  %1149 = vst [vmem:[%s2336_s26 + $0x100] sm:$0xff] %v1085_v50  ;;  %v987_v51 = vmul.f32 %v2323_v29, %v2919_v4  ;;  %v2935_v4 = vld [vmem:[#allocation97_spill] sm:$0xff] }
  0xee   : > { %1150 = vst [vmem:[%s2336_s26 + $0x108] sm:$0xff] %v1086_v48  ;;  %1151 = vst [vmem:[%s2336_s26 + $0x110] sm:$0xff] %v1087_v57  ;;  %v988_v11 = vmul.f32 %v2267_v39, %v2920_v5  ;;  %v989_v16 = vmul.f32 %v2270_v21, %v2921_v47  ;;  %v990_v61 = vmul.f32 %v2273_v62, %v2922_v23  ;;  %v2936_v5 = vld [vmem:[#allocation98_spill] sm:$0xff]  ;;  %v2937_v47 = vld [vmem:[#allocation100_spill] sm:$0xff] }
  0xef   : > { %1152 = vst [vmem:[%s2336_s26 + $0x118] sm:$0xff] %v1088_v27  ;;  %1153 = vst [vmem:[%s2336_s26 + $0x120] sm:$0xff] %v1089_v49  ;;  %v991_v7 = vmul.f32 %v2276_v55, %v2923_v44  ;;  %v992_v24 = vmul.f32 %v2279_v33, %v2924_v46  ;;  %v993_v31 = vmul.f32 %v2282_v54, %v2925_v10  ;;  %v2938_v23 = vld [vmem:[#allocation101_spill] sm:$0xff]  ;;  %v2939_v44 = vld [vmem:[#allocation102_spill] sm:$0xff] }
  0xf0   : > { %1154 = vst [vmem:[%s2336_s26 + $0x128] sm:$0xff] %v1090_v41  ;;  %1155 = vst [vmem:[%s2336_s26 + $0x130] sm:$0xff] %v1091_v2  ;;  %v994_v59 = vmul.f32 %v2285_v40, %v2926_v37  ;;  %v1092_v38 = vadd.f32 %v2343_v25, %v987_v51  ;;  %v1093_v42 = vadd.f32 %v2302_v19, %v988_v11  ;;  %v2940_v46 = vld [vmem:[#allocation104_spill] sm:$0xff]  ;;  %v2942_v10 = vld [vmem:[#allocation106_spill] sm:$0xff] }
  0xf1   : > { %v1094_v14 = vadd.f32 %v2305_v22, %v989_v16  ;;  %v1095_v45 = vadd.f32 %v2308_v15, %v990_v61  ;;  %v1096_v32 = vadd.f32 %v2311_v30, %v991_v7  ;;  %v1097_v3 = vadd.f32 %v2314_v28, %v992_v24  ;;  %v2941_v24 = vld [vmem:[#allocation105_spill] sm:$0xff] }
  0xf2   : > { %v1098_v17 = vadd.f32 %v2317_v34, %v993_v31  ;;  %v1099_v8 = vadd.f32 %v2320_v1, %v994_v59  ;;  %1156 = vst [vmem:[%s2336_s26 + $0x138] sm:$0xff] %v1092_v38  ;;  %1157 = vst [vmem:[%s2336_s26 + $0x140] sm:$0xff] %v1093_v42  ;;  %v995_v12 = vmul.f32 %v2323_v29, %v2927_v56 }
  0xf3   : > { %1158 = vst [vmem:[%s2336_s26 + $0x148] sm:$0xff] %v1094_v14  ;;  %1159 = vst [vmem:[%s2336_s26 + $0x150] sm:$0xff] %v1095_v45  ;;  %v996_v26 = vmul.f32 %v2267_v39, %v2928_v18  ;;  %v997_v20 = vmul.f32 %v2270_v21, %v2929_v0  ;;  %v998_v35 = vmul.f32 %v2273_v62, %v2930_v36 }
  0xf4   : > { %1160 = vst [vmem:[%s2336_s26 + $0x158] sm:$0xff] %v1096_v32  ;;  %1161 = vst [vmem:[%s2336_s26 + $0x160] sm:$0xff] %v1097_v3  ;;  %v999_v13 = vmul.f32 %v2276_v55, %v2931_v60  ;;  %v1000_v9 = vmul.f32 %v2279_v33, %v2932_v6  ;;  %v1001_v53 = vmul.f32 %v2282_v54, %v2933_v52 }
  0xf5   : > { %1162 = vst [vmem:[%s2336_s26 + $0x168] sm:$0xff] %v1098_v17  ;;  %1163 = vst [vmem:[%s2336_s26 + $0x170] sm:$0xff] %v1099_v8  ;;  %v1002_v58 = vmul.f32 %v2285_v40, %v2934_v63  ;;  %v1100_v43 = vadd.f32 %v2343_v25, %v995_v12  ;;  %v1101_v50 = vadd.f32 %v2302_v19, %v996_v26 }
  0xf6   : > { %v1102_v48 = vadd.f32 %v2305_v22, %v997_v20  ;;  %v1103_v57 = vadd.f32 %v2308_v15, %v998_v35  ;;  %v1104_v27 = vadd.f32 %v2311_v30, %v999_v13  ;;  %v1105_v49 = vadd.f32 %v2314_v28, %v1000_v9 }
  0xf7   : > { %v1106_v41 = vadd.f32 %v2317_v34, %v1001_v53  ;;  %v1107_v2 = vadd.f32 %v2320_v1, %v1002_v58  ;;  %1164 = vst [vmem:[%s2336_s26 + $0x178] sm:$0xff] %v1100_v43  ;;  %1165 = vst [vmem:[%s2336_s26 + $0x180] sm:$0xff] %v1101_v50  ;;  %v1003_v51 = vmul.f32 %v2323_v29, %v2935_v4 }
  0xf8   : > { %1166 = vst [vmem:[%s2336_s26 + $0x188] sm:$0xff] %v1102_v48  ;;  %1167 = vst [vmem:[%s2336_s26 + $0x190] sm:$0xff] %v1103_v57  ;;  %v1004_v11 = vmul.f32 %v2267_v39, %v2936_v5  ;;  %v1005_v16 = vmul.f32 %v2270_v21, %v2937_v47  ;;  %v1006_v61 = vmul.f32 %v2273_v62, %v2938_v23 }
  0xf9   : > { %1168 = vst [vmem:[%s2336_s26 + $0x198] sm:$0xff] %v1104_v27  ;;  %1169 = vst [vmem:[%s2336_s26 + $0x1a0] sm:$0xff] %v1105_v49  ;;  %v1007_v7 = vmul.f32 %v2276_v55, %v2939_v44  ;;  %v1008_v39 = vmul.f32 %v2279_v33, %v2940_v46  ;;  %v1009_v21 = vmul.f32 %v2282_v54, %v2941_v24 }
  0xfa   : > { %1170 = vst [vmem:[%s2336_s26 + $0x1a8] sm:$0xff] %v1106_v41  ;;  %1171 = vst [vmem:[%s2336_s26 + $0x1b0] sm:$0xff] %v1107_v2  ;;  %v1010_v62 = vmul.f32 %v2285_v40, %v2942_v10  ;;  %v1108_v31 = vadd.f32 %v2343_v25, %v1003_v51  ;;  %v1109_v37 = vadd.f32 %v2302_v19, %v1004_v11  ;;  %v1406_v19 = vld [vmem:[%s1659_s27 + $0x1f8] sm:$0xff]  ;;  %s1182_s27 = scalar_lea.sflag [#allocation5], %s1653_s19 }
  0xfb   : > { %v1110_v55 = vadd.f32 %v2305_v22, %v1005_v16  ;;  %v1111_v33 = vadd.f32 %v2308_v15, %v1006_v61  ;;  %v1112_v54 = vadd.f32 %v2311_v30, %v1007_v7  ;;  %v1113_v59 = vadd.f32 %v2314_v28, %v1008_v39 }
  0xfc   : > { %v1114_v40 = vadd.f32 %v2317_v34, %v1009_v21  ;;  %v1115_v38 = vadd.f32 %v2320_v1, %v1010_v62  ;;  %1172 = vst [vmem:[%s2336_s26 + $0x1b8] sm:$0xff] %v1108_v31  ;;  %1173 = vst [vmem:[%s2336_s26 + $0x1c0] sm:$0xff] %v1109_v37  ;;  %v1011_v22 = vmul.f32 %v1406_v19, %v2323_v29 }
  0xfd   : > { %1174 = vst [vmem:[%s2336_s26 + $0x1c8] sm:$0xff] %v1110_v55  ;;  %1175 = vst [vmem:[%s2336_s26 + $0x1d0] sm:$0xff] %v1111_v33 }
  0xfe   : > { %1176 = vst [vmem:[%s2336_s26 + $0x1d8] sm:$0xff] %v1112_v54  ;;  %1177 = vst [vmem:[%s2336_s26 + $0x1e0] sm:$0xff] %v1113_v59  ;;  %v1116_v15 = vadd.f32 %v2343_v25, %v1011_v22 }
  0xff   : > { %1178 = vst [vmem:[%s2336_s26 + $0x1e8] sm:$0xff] %v1114_v40  ;;  %1179 = vst [vmem:[%s2336_s26 + $0x1f0] sm:$0xff] %v1115_v38 }
 0x100   : > { %1180 = vst [vmem:[%s2336_s26 + $0x1f8] sm:$0xff] %v1116_v15 }
 0x101   : > { %1450 = shalt.err (!%p1447_p5)
}
 0x102   : > { %s1451_s9 = scalar_lea.hbm %s2573_s15, 8192  ;;  %s1455_s12 = scalar_lea.hbm %s2629_s4, 16384 }
 0x103   : > { %p1452_p7 = scmp.ne.s32.totalorder %s2573_s15, %s1451_s9  ;;  %p1456_p0 = scmp.lt.u32.totalorder %s2573_s15, %s2629_s4 }
 0x104   : > { %p1457_p2 = scmp.lt.u32.totalorder %s1455_s12, %s1451_s9  ;;  %p1459_p11 = scmp.lt.u32.totalorder %s1451_s9, %s2573_s15 }
 0x105   : > { %p1453_p8 = pnand %p1452_p7, %p2943_p12 }
 0x106   : > { %p1458_p6 = por %p1457_p2, %p1456_p0 }
 0x107   : > { %p1454_p9 = pneg %p1453_p8 }
 0x108   : > { %p1460_p13 = por %p1459_p11, %p1458_p6 }
 0x10a   : > { %p1461_p4 = pnand %p1460_p13, %p1454_p9 }
 0x10c   : > { %1464 = shalt.err (!%p1461_p4)
}
 0x10d   : > { %s1511_s26 = smov 1024   ;;  %s1512_s24 = smov 2048  }
 0x10e   : > { %s1513_s0 = smov 64  }
 0x10f   : > { %1353 = dma.vmem_to_hbm [thread:$0]  (%p2943_p12), %s2579_s13, 8192, %s2573_s15, %s1182_s27, %s1511_s26, %s1512_s24, %s1513_s0  }
 0x110 PF: > { %s1219_s30 = sand.u32 1, %s1491_s20   ;;  %p2944_p10 = scmp.ne.s32.totalorder %s2716_s7, 0 }
 0x111   : > { %p2945_p1 = scmp.ge.s32.totalorder %s1503_s23, 2  ;;  %s1220_s16 = scalar_lea.sflag [#allocation5], %s1219_s30 }
 0x113   : > { %p1360_p3 = pnand %p2945_p1, %p2944_p10 }
 0x115   : > { %1486 = dma.done.wait (!%p1360_p3), %s1220_s16, 8192  }
 0x116   : > { %1488 = vsyncadd (!%p1360_p3), %s1220_s16, 4294959104  ;;  %p20_p5 = scmp.ge.s32.totalorder %s1572_s25, 4   ;;  %s2946_s20 = smov %s1495_s21 }
 0x117   : > { %s2947_s21 = smov %s1499_s22  ;;  %s2948_s22 = smov %s1584_s28 }
 0x118   : > { %s2949_s23 = smov %s1572_s25  ;;  %22 = sbr.rel (!%p20_p5) target bundleno = 7 (0x7), region = 102 }
 0x11f   :  { %1233 = vsyncpa [#allocation4], 1 }
 0x120   :  { %1235 = vsyncpa [#allocation4 + $0x1], 1 }
 0x121   :  { %1236 = vsyncpa [#allocation5], 1 }
 0x122   :  { %1238 = vsyncpa [#allocation5 + $0x1], 1 }

</bundles_post_ra>
